<compile_context>
chip_gen: v7x
topology: tpu7x:2x2x1
jax: 0.10.0
libtpu: 0.0.40
codegen_flags: <defaults>
</compile_context>

<pallas_src>
import numpy as np
import jax
import jax.numpy as jnp
from jax.experimental import pallas as pl
from jax.experimental.pallas import tpu as pltpu


def _round_up(x, m):
    return ((x + m - 1) // m) * m


# ----------------------------------------------------------------------------
# Kernel A (one-shot precompute): text prompt-mean + L2 normalize, tau_inv
# folded in, output TRANSPOSED to (D_pad, C_pad) so the per-call score matmul
# contracts the RHS's leading dim (MXU-native layout, no per-call relayout).
#   text_features = stack(list).mean(1); normalize; *= tau_inv; .T
# ----------------------------------------------------------------------------
def _text_kernel(tau_ref, text_ref, out_ref):
    text = text_ref[...]                                   # (C_pad, K, D_pad)
    k = text.shape[1]
    text_mean = jnp.sum(text, axis=1) * (1.0 / k)          # == stack(list).mean(1)
    sq = jnp.sum(text_mean * text_mean, axis=-1, keepdims=True)
    # eps clamp: zero-padded class rows give rsqrt(1e-24) * 0 == 0 (no NaN/garbage
    # can leak); do NOT drop the clamp in future edits.
    inv_norm = jax.lax.rsqrt(jnp.maximum(sq, 1e-24))       # EUP rsqrt
    scaled = (tau_ref[0] * inv_norm) * text_mean           # (C_pad, D_pad)
    out_ref[...] = jnp.transpose(scaled)                   # one-shot XLU transpose


def precompute_text_classifier(text_features_stacked, tau_inv):
    """(C, K, D) f32, (1,) f32 -> (D_pad, C_pad) f32 scaled/normalized classifier^T."""
    c, k, d = text_features_stacked.shape
    c_pad = _round_up(c, 128)    # lane-dense (B_pad, C_pad) score output
    d_pad = _round_up(d, 128)    # MXU-friendly contraction dim
    text_p = jnp.pad(text_features_stacked.astype(jnp.float32),
                     ((0, c_pad - c), (0, 0), (0, d_pad - d)))
    # TODO(synk): for very large open-vocab class sets, cast the stored
    # classifier to bf16 (keep f32 accumulation in the matmul) to halve its
    # VMEM/HBM footprint — biggest relative win on v6e/v7x.
    return pl.pallas_call(
        _text_kernel,
        out_shape=jax.ShapeDtypeStruct((d_pad, c_pad), jnp.float32),
        in_specs=[
            pl.BlockSpec(memory_space=pltpu.MemorySpace.SMEM),   # tau_inv scalar
            pl.BlockSpec(memory_space=pltpu.MemorySpace.VMEM),   # text features
        ],
        out_specs=pl.BlockSpec(memory_space=pltpu.MemorySpace.VMEM),
    )(tau_inv.astype(jnp.float32), text_p)


# ----------------------------------------------------------------------------
# Kernel B (per forward call, fused): box clip + normalize  AND  visual
# L2-normalize + scaled cosine-similarity matmul, in one launch.
#   boxes_ref : (B, rows, 128) lane-dense flat xyxy, zero-padded
#   maxv_ref  : (B, 1, 128)  [w-1, h-1, w-1, h-1, ...] per image
#   invs_ref  : (B, 1, 128)  [1/w, 1/h, 1/w, 1/h, ...] per image
#   vis_ref   : (B_pad, D_pad) visual CLS features (zero-padded)
#   txt_ref   : (D_pad, C_pad) pre-transposed, tau_inv-scaled text classifier
# ----------------------------------------------------------------------------
def _fused_kernel(boxes_ref, maxv_ref, invs_ref, vis_ref, txt_ref,
                  box_out_ref, score_out_ref):
    # --- Box path (VPU): clip to [0, w-1]/[0, h-1], divide by w/h. ---
    # Padded rows are zeros: clip -> 0, * inv_scale -> 0 (harmless, sliced off).
    clipped = jnp.minimum(jnp.maximum(boxes_ref[...], 0.0), maxv_ref[...])
    box_out_ref[...] = clipped * invs_ref[...]

    # --- Score path: visual L2 normalize (EUP rsqrt) + cosine matmul (MXU). ---
    vis = vis_ref[...]                                     # (B_pad, D_pad)
    sq = jnp.sum(vis * vis, axis=-1, keepdims=True)
    vis_n = vis * jax.lax.rsqrt(jnp.maximum(sq, 1e-24))    # eps clamp, no NaN on pad rows
    # txt_ref is pre-transposed: standard (M,K)@(K,N) contraction, no relayout.
    score_out_ref[...] = jax.lax.dot_general(
        vis_n, txt_ref[...],
        dimension_numbers=(((1,), (0,)), ((), ())),
        preferred_element_type=jnp.float32)                # (B_pad, C_pad)


# ----------------------------------------------------------------------------
# NaiveBaseline forward (use_roi_feat=False inference path).
# Returns dense padded outputs + counts to avoid per-image XLA op fan-out:
#   scores     : (B, C)        per-image action scores
#   boxes_norm : (B, N_pad, 4) clipped & normalized boxes (zero-padded rows)
#   box_counts : list[int]     valid boxes per image
# ----------------------------------------------------------------------------
def naive_baseline_forward(cls_feat_visual, text_features_stacked, tau_inv,
                           whwh, prior_boxes, text_classifier=None):
    bsz = len(prior_boxes)
    num_classes = text_features_stacked.shape[0]

    if text_classifier is None:
        # Text features are constant across forward calls -> cache in practice.
        text_classifier = precompute_text_classifier(text_features_stacked, tau_inv)
    d_pad, c_pad = text_classifier.shape

    # ---- Host-side (numpy) box padding: one (B, N_pad, 4) slab, one transfer.
    box_counts = [int(np.asarray(b).shape[0]) for b in prior_boxes]
    n_max = max(box_counts)
    n_pad = max(_round_up(n_max, 256), 256)   # n_pad*4 multiple of 1024 -> rows % 8 == 0
    flat_len = n_pad * 4
    rows = flat_len // 128
    boxes_host = np.zeros((bsz, n_pad, 4), dtype=np.float32)
    for i, b in enumerate(prior_boxes):
        nb = np.asarray(b, dtype=np.float32)
        boxes_host[i, :nb.shape[0]] = nb
    boxes_flat = jnp.asarray(boxes_host.reshape(bsz, rows, 128))  # lane-dense

    # ---- Per-image clip/scale vectors (a couple of tiny XLA ops per forward,
    #      not per image).  In the flat xyxy stream even lanes are x, odd are y.
    whwh_f = whwh.astype(jnp.float32)
    wh = whwh_f[:, :2]                                              # (B, 2) = (w, h)
    max_v = jnp.tile(wh - 1.0, (1, 64)).reshape(bsz, 1, 128)        # [w-1, h-1, ...]
    inv_s = jnp.tile(1.0 / wh, (1, 64)).reshape(bsz, 1, 128)        # [1/w, 1/h, ...]

    # ---- Pad visual features to MXU / lane-friendly shapes.
    b, d = cls_feat_visual.shape
    b_pad = _round_up(b, 8)
    vis_p = jnp.pad(cls_feat_visual.astype(jnp.float32),
                    ((0, b_pad - b), (0, d_pad - d)))

    # ---- Single fused pallas_call: box clip/normalize + action scores.
    # TODO(synk): if C_pad*D_pad*4 bytes approaches scoped VMEM (16 MiB default
    # v5e, 32 MiB v6e/v7x, 64 MiB physical v7x), tile the classifier over C with
    # a gridded BlockSpec (parallel) instead of whole-array VMEM blocks.
    boxes_norm_flat, scores_p = pl.pallas_call(
        _fused_kernel,
        out_shape=(jax.ShapeDtypeStruct((bsz, rows, 128), jnp.float32),
                   jax.ShapeDtypeStruct((b_pad, c_pad), jnp.float32)),
        in_specs=[pl.BlockSpec(memory_space=pltpu.MemorySpace.VMEM)] * 5,
        out_specs=(pl.BlockSpec(memory_space=pltpu.MemorySpace.VMEM),
                   pl.BlockSpec(memory_space=pltpu.MemorySpace.VMEM)),
    )(boxes_flat, max_v, inv_s, vis_p, text_classifier)

    boxes_norm = boxes_norm_flat.reshape(bsz, n_pad, 4)
    scores = scores_p[:b, :num_classes]                             # (B, C)
    return scores, boxes_norm, box_counts


def unpack_to_lists(scores, boxes_norm, box_counts):
    """Optional host-side unpack into the PyTorch-style per-image lists."""
    action_score_list, box_list = [], []
    for i, n in enumerate(box_counts):
        box_list.append(boxes_norm[i, :n])
        action_score_list.append(
            jnp.broadcast_to(scores[i:i + 1], (n, scores.shape[1])))
    return action_score_list, box_list


if __name__ == "__main__":
    key = jax.random.PRNGKey(0)
    B, D, C, K = 2, 32, 8, 4          # batch, feat dim, num classes, prompts/class

    k1, k2, k3, k4 = jax.random.split(key, 4)
    # "Backbone outputs" — deterministic synthetic features.
    cls_feat_visual = jax.random.normal(k1, (B, D), dtype=jnp.float32)
    text_features_stacked = jax.random.normal(k2, (C, K, D), dtype=jnp.float32)
    tau_inv = jnp.array([100.0], dtype=jnp.float32)   # CLIP logit scale

    # Per-image sizes (w, h, w, h) and loaded prior boxes (pixel xyxy).
    whwh = jnp.array([[320.0, 240.0, 320.0, 240.0],
                      [640.0, 480.0, 640.0, 480.0]], dtype=jnp.float32)
    prior_boxes = [
        np.asarray(jax.random.uniform(k3, (3, 4), dtype=jnp.float32,
                                      minval=0.0, maxval=350.0)),
        np.asarray(jax.random.uniform(k4, (5, 4), dtype=jnp.float32,
                                      minval=0.0, maxval=700.0)),
    ]

    # Text classifier is constant across calls -> precompute once (one-shot).
    text_classifier = precompute_text_classifier(text_features_stacked, tau_inv)

    scores, boxes_norm, box_counts = naive_baseline_forward(
        cls_feat_visual, text_features_stacked, tau_inv, whwh, prior_boxes,
        text_classifier=text_classifier)
    jax.block_until_ready(scores)
    jax.block_until_ready(boxes_norm)

    # PyTorch-style list outputs (host-side unpack, only for the ref check).
    action_score_list, box_list = unpack_to_lists(scores, boxes_norm, box_counts)

    # Lightweight pure-JAX reference check.
    text_mean = text_features_stacked.mean(axis=1)
    text_n = text_mean / jnp.linalg.norm(text_mean, axis=-1, keepdims=True)
    vis_n = cls_feat_visual / jnp.linalg.norm(cls_feat_visual, axis=-1, keepdims=True)
    ref_scores = tau_inv[0] * (vis_n @ text_n.T)
    assert jnp.allclose(scores, ref_scores, atol=1e-3, rtol=1e-4)
    for i in range(B):
        w, h = whwh[i, 0], whwh[i, 1]
        bx = jnp.asarray(prior_boxes[i])
        ref_box = jnp.stack([
            jnp.clip(bx[:, 0], 0.0, w - 1.0) / w,
            jnp.clip(bx[:, 1], 0.0, h - 1.0) / h,
            jnp.clip(bx[:, 2], 0.0, w - 1.0) / w,
            jnp.clip(bx[:, 3], 0.0, h - 1.0) / h,
        ], axis=-1)
        assert jnp.allclose(box_list[i], ref_box, atol=1e-5, rtol=1e-5)
        ref_sc = jnp.broadcast_to(ref_scores[i:i + 1], (bx.shape[0], C))
        assert jnp.allclose(action_score_list[i], ref_sc, atol=1e-3, rtol=1e-4)

    print("KERNEL_OK")
</pallas_src>

<mosaic_0001>
module attributes {stable_mosaic.version = 11 : i64} {
  func.func @_text_kernel(%arg0: memref<1xf32, #tpu.memory_space<smem>>, %arg1: memref<128x4x128xf32, #tpu.memory_space<vmem>>, %arg2: memref<128x128xf32, #tpu.memory_space<vmem>>) attributes {dimension_semantics = [], scalar_prefetch = 0 : i64, scratch_operands = 0 : i64, tpu.core_type = #tpu.core_type<tc>} {
    %c0 = arith.constant 0 : index
    %c0_0 = arith.constant 0 : index
    %c0_1 = arith.constant 0 : index
    %0 = vector.load %arg1[%c0, %c0_0, %c0_1] : memref<128x4x128xf32, #tpu.memory_space<vmem>>, vector<128x4x128xf32>
    %cst = arith.constant dense<0.000000e+00> : vector<128x128xf32>
    %1 = vector.multi_reduction <add>, %0, %cst [1] : vector<128x4x128xf32> to vector<128x128xf32>
    %cst_2 = arith.constant 2.500000e-01 : f32
    %2 = vector.broadcast %cst_2 : f32 to vector<128x128xf32>
    %3 = arith.mulf %1, %2 : vector<128x128xf32>
    %4 = arith.mulf %3, %3 : vector<128x128xf32>
    %cst_3 = arith.constant dense<0.000000e+00> : vector<128xf32>
    %5 = vector.multi_reduction <add>, %4, %cst_3 [1] : vector<128x128xf32> to vector<128xf32>
    %6 = vector.shape_cast %5 : vector<128xf32> to vector<128x1xf32>
    %cst_4 = arith.constant 1.000000e-24 : f32
    %7 = vector.broadcast %cst_4 : f32 to vector<128x1xf32>
    %8 = arith.maximumf %6, %7 : vector<128x1xf32>
    %9 = math.rsqrt %8 : vector<128x1xf32>
    %c0_5 = arith.constant 0 : index
    %10 = memref.load %arg0[%c0_5] : memref<1xf32, #tpu.memory_space<smem>>
    %11 = vector.broadcast %10 : f32 to vector<128x1xf32>
    %12 = arith.mulf %11, %9 : vector<128x1xf32>
    %13 = vector.broadcast %12 : vector<128x1xf32> to vector<128x128xf32>
    %14 = arith.mulf %13, %3 : vector<128x128xf32>
    %15 = tpu.transpose %14, [1, 0] : vector<128x128xf32> -> vector<128x128xf32>
    %c0_6 = arith.constant 0 : index
    %c0_7 = arith.constant 0 : index
    %16 = vector.load %arg2[%c0_6, %c0_7] : memref<128x128xf32, #tpu.memory_space<vmem>>, vector<128x128xf32>
    tpu.vector_store %arg2[%c0_6, %c0_7], %15 {strides = array<i32>} : memref<128x128xf32, #tpu.memory_space<vmem>>, vector<128x128xf32>,
    return
  }
}

</mosaic_0001>

<bundles_post_ra>
// kernel: tpu_custom_call.1
= control target key start
LH: loop header
LB: loop body
LE: loop exit
PB: predicated region body
PF: predicated region fallthrough
CT: control target
= control target key end

     0   :  { %8 = vsyncpa [#allocation4], 0  ;;  %s3140_s0 = inlined_call_operand.<no memory space> [shape: f32[1], index: 0, kind: input, shape index: {}]   ;;  %s3141_s1 = inlined_call_operand.hbm [shape: f32[128,4,128], index: 1, kind: input, shape index: {}]   ;;  %s3142_s2 = inlined_call_operand.hbm [shape: f32[128,128], index: 2, kind: output, shape index: {}]  }
   0x1   :  { %9 = vsyncpa [#allocation5], 0  ;;  %s2076_s9 = smov [#allocation3]   ;;  %s2028_s13 = scalar_lea.hbm %s3141_s1, 8192 }
   0x2   :  { %s17_s10 = sshll.u32 %s2076_s9, 4  ;;  %p2029_p0 = scmp.ne.s32.totalorder %s3141_s1, %s2028_s13  ;;  %s18_s10 = int_to_ptr.vmem [resolvable:$true] %s17_s10 }
   0x3   :  { %p2032_p1 = scmp.lt.u32.totalorder %s2028_s13, %s3141_s1 }
   0x5   :  { %p2034_p2 = pnand %p2032_p1, %p2029_p0 }
   0x7   :  { %2037 = shalt.err (!%p2034_p2)
}
   0x8   :  { %s2038_s18 = scalar_lea.vmem %s18_s10, 8192  ;;  %p2043_p4 = scmp.lt.s32.totalorder %s18_s10, %s18_s10 }
   0x9   :  { %p2039_p3 = scmp.ne.s32.totalorder %s18_s10, %s2038_s18  ;;  %p2044_p5 = scmp.lt.s32.totalorder %s2038_s18, %s2038_s18 }
   0xb   :  { %p2045_p6 = por %p2044_p5, %p2043_p4 }
   0xd   :  { %p2046_p7 = pnand %p2045_p6, %p2039_p3 }
   0xf   :  { %2049 = shalt.err (!%p2046_p7)
}
  0x10   :  { %s2077_s19 = smov 64   ;;  %s2078_s20 = smov 4  }
  0x11   :  { %23 = dma.hbm_to_vmem [thread:$0]  %s3141_s1, 8192, %s18_s10, [#allocation4], %s2077_s19, %s2077_s19, %s2078_s20  }
  0x12   :  { %2072 = dma.done.wait [#allocation4], 8192  }
  0x13   :  { %2073 = vsyncadd [#allocation4], 4294959104  ;;  %vm155_vm0 = vcmask 1043456   ;;  %v27_v0 = vld [vmem:[#allocation3] sm:$0xf]  ;;  %vm1436_vm1 = vcmask 1041409  }
  0x14   :  { %v28_v1 = vld [vmem:[#allocation3 + $0x4] sm:$0xf]  ;;  %v29_v2 = vld [vmem:[#allocation3 + $0x8] sm:$0xf]  ;;  %v30_v3 = vld [vmem:[#allocation3 + $0xc] sm:$0xf] }
  0x15   :  { %v31_v4 = vld [vmem:[#allocation3 + $0x10] sm:$0xf]  ;;  %v32_v5 = vld [vmem:[#allocation3 + $0x14] sm:$0xf]  ;;  %v33_v6 = vld [vmem:[#allocation3 + $0x18] sm:$0xf] }
  0x16   :  { %v156_v7 = vsel %vm155_vm0, %v27_v0, 0.0  ;;  %v163_v8 = vsel %vm155_vm0, %v28_v1, 0.0  ;;  %v34_v9 = vld [vmem:[#allocation3 + $0x1c] sm:$0xf]  ;;  %v170_v12 = vsel %vm155_vm0, %v29_v2, 0.0  ;;  %v177_v13 = vsel %vm155_vm0, %v30_v3, 0.0 }
  0x17   :  { %v157_v10 = vrot.slane %v156_v7, 4  ;;  %v164_v11 = vrot.slane %v163_v8, 4  ;;  %v171_v14 = vrot.slane %v170_v12, 4  ;;  %v178_v15 = vrot.slane %v177_v13, 4  ;;  %v35_v2 = vld [vmem:[#allocation3 + $0x20] sm:$0xf] }
  0x18   :  { %v184_v16 = vsel %vm155_vm0, %v31_v4, 0.0  ;;  %v191_v17 = vsel %vm155_vm0, %v32_v5, 0.0  ;;  %v198_v24 = vsel %vm155_vm0, %v33_v6, 0.0  ;;  %v205_v25 = vsel %vm155_vm0, %v34_v9, 0.0 }
  0x19   :  { %v158_v18 = vadd.f32 %v157_v10, %v156_v7  ;;  %v165_v19 = vadd.f32 %v164_v11, %v163_v8  ;;  %v185_v20 = vrot.slane %v184_v16, 4  ;;  %v192_v21 = vrot.slane %v191_v17, 4  ;;  %v36_v11 = vld [vmem:[#allocation3 + $0x24] sm:$0xf] }
  0x1a   :  { %v172_v22 = vadd.f32 %v171_v14, %v170_v12  ;;  %v179_v23 = vadd.f32 %v178_v15, %v177_v13  ;;  %v199_v32 = vrot.slane %v198_v24, 4  ;;  %v206_v33 = vrot.slane %v205_v25, 4  ;;  %v37_v12 = vld [vmem:[#allocation3 + $0x28] sm:$0xf]  ;;  %v38_v13 = vld [vmem:[#allocation3 + $0x2c] sm:$0xf] }
  0x1b   :  { %v159_v26 = vrot.slane %v158_v18, 2  ;;  %v166_v27 = vrot.slane %v165_v19, 2  ;;  %v186_v28 = vadd.f32 %v185_v20, %v184_v16  ;;  %v193_v29 = vadd.f32 %v192_v21, %v191_v17  ;;  %v39_v21 = vld [vmem:[#allocation3 + $0x30] sm:$0xf] }
  0x1c   :  { %v173_v30 = vrot.slane %v172_v22, 2  ;;  %v180_v31 = vrot.slane %v179_v23, 2  ;;  %vm1438_vm2 = vcmask 1042434   ;;  %v200_v40 = vadd.f32 %v199_v32, %v198_v24  ;;  %v40_v24 = vld [vmem:[#allocation3 + $0x34] sm:$0xf] }
  0x1d   :  { %v160_v34 = vadd.f32 %v159_v26, %v158_v18  ;;  %v167_v35 = vadd.f32 %v166_v27, %v165_v19  ;;  %v187_v36 = vrot.slane %v186_v28, 2  ;;  %v194_v37 = vrot.slane %v193_v29, 2 }
  0x1e   :  { %v174_v38 = vadd.f32 %v173_v30, %v172_v22  ;;  %v181_v39 = vadd.f32 %v180_v31, %v179_v23  ;;  %v207_v41 = vadd.f32 %v206_v33, %v205_v25  ;;  %vm1440_vm3 = vcmask 1043459   ;;  %v41_v33 = vld [vmem:[#allocation3 + $0x38] sm:$0xf] }
  0x1f   :  { %v161_v42 = vrot.slane %v160_v34, 1  ;;  %v168_v43 = vrot.slane %v167_v35, 1  ;;  %v188_v44 = vadd.f32 %v187_v36, %v186_v28  ;;  %v195_v45 = vadd.f32 %v194_v37, %v193_v29 }
  0x20   :  { %vm1442_vm4 = vcmask 1044484   ;;  %v175_v46 = vrot.slane %v174_v38, 1  ;;  %v182_v47 = vrot.slane %v181_v39, 1  ;;  %v201_v48 = vrot.slane %v200_v40, 2 }
  0x21   :  { %v208_v49 = vrot.slane %v207_v41, 2  ;;  %vm1444_vm5 = vcmask 1045509   ;;  %v162_v50 = vadd.f32 %v161_v42, %v160_v34  ;;  %v169_v51 = vadd.f32 %v168_v43, %v167_v35  ;;  %v42_v42 = vld [vmem:[#allocation3 + $0x3c] sm:$0xf] }
  0x22   :  { %v189_v52 = vrot.slane %v188_v44, 1  ;;  %v196_v53 = vrot.slane %v195_v45, 1  ;;  %vm1446_vm6 = vcmask 1046534   ;;  %v176_v54 = vadd.f32 %v175_v46, %v174_v38 }
  0x23   :  { %v183_v55 = vadd.f32 %v182_v47, %v181_v39  ;;  %v202_v56 = vadd.f32 %v201_v48, %v200_v40  ;;  %v209_v57 = vadd.f32 %v208_v49, %v207_v41  ;;  %vm1448_vm7 = vcmask 1047559  }
  0x24   :  { %v190_v58 = vadd.f32 %v189_v52, %v188_v44  ;;  %v197_v59 = vadd.f32 %v196_v53, %v195_v45  ;;  %v2117_v60 = vmul.f32 0.25, %v162_v50  ;;  %v2119_v61 = vmul.f32 0.25, %v169_v51 }
  0x25   :  { %v203_v62 = vrot.slane %v202_v56, 1  ;;  %v210_v63 = vrot.slane %v209_v57, 1  ;;  %v2121_v0 = vmul.f32 0.25, %v176_v54  ;;  %v2123_v1 = vmul.f32 0.25, %v183_v55 }
  0x26   :  { %v2125_v3 = vmul.f32 0.25, %v190_v58  ;;  %v2127_v4 = vmul.f32 0.25, %v197_v59  ;;  %v1180_v5 = vmul.f32 %v2117_v60, %v2117_v60  ;;  %v1181_v6 = vmul.f32 %v2119_v61, %v2119_v61 }
  0x27   :  { %v204_v7 = vadd.f32 %v203_v62, %v202_v56  ;;  %v211_v8 = vadd.f32 %v210_v63, %v209_v57  ;;  %v1182_v9 = vmul.f32 %v2121_v0, %v2121_v0  ;;  %v1183_v10 = vmul.f32 %v2123_v1, %v2123_v1 }
  0x28   :  { %v1184_v14 = vmul.f32 %v2125_v3, %v2125_v3  ;;  %v1185_v15 = vmul.f32 %v2127_v4, %v2127_v4  ;;  %v1437_v16 = vsel %vm1436_vm1, %v1181_v6, %v1180_v5  ;;  %v212_v17 = vsel %vm155_vm0, %v35_v2, 0.0 }
  0x29   :  { %v2143_v18 = vmul.f32 0.25, %v204_v7  ;;  %v2145_v19 = vmul.f32 0.25, %v211_v8  ;;  %v1439_v20 = vsel %vm1438_vm2, %v1182_v9, %v1437_v16  ;;  %v213_v22 = vrot.slane %v212_v17, 4 }
  0x2a   :  { %v1441_v23 = vsel %vm1440_vm3, %v1183_v10, %v1439_v20  ;;  %v219_v25 = vsel %vm155_vm0, %v36_v11, 0.0  ;;  %v226_v26 = vsel %vm155_vm0, %v37_v12, 0.0  ;;  %v233_v27 = vsel %vm155_vm0, %v38_v13, 0.0 }
  0x2b   :  { %v1186_v28 = vmul.f32 %v2143_v18, %v2143_v18  ;;  %v1187_v29 = vmul.f32 %v2145_v19, %v2145_v19  ;;  %v1443_v30 = vsel %vm1442_vm4, %v1184_v14, %v1441_v23  ;;  %v214_v31 = vadd.f32 %v213_v22, %v212_v17  ;;  %v43_v22 = vld [vmem:[#allocation3 + $0x40] sm:$0xf] }
  0x2c   :  { %v1445_v32 = vsel %vm1444_vm5, %v1185_v15, %v1443_v30  ;;  %v220_v34 = vrot.slane %v219_v25, 4  ;;  %v227_v35 = vrot.slane %v226_v26, 4  ;;  %v234_v36 = vrot.slane %v233_v27, 4 }
  0x2d   :  { %v1447_v37 = vsel %vm1446_vm6, %v1186_v28, %v1445_v32  ;;  %v215_v38 = vrot.slane %v214_v31, 2  ;;  %v240_v39 = vsel %vm155_vm0, %v39_v21, 0.0  ;;  %v247_v40 = vsel %vm155_vm0, %v40_v24, 0.0 }
  0x2e   :  { %v1449_v41 = vsel %vm1448_vm7, %v1187_v29, %v1447_v37  ;;  %v221_v43 = vadd.f32 %v220_v34, %v219_v25  ;;  %v228_v44 = vadd.f32 %v227_v35, %v226_v26  ;;  %v235_v45 = vadd.f32 %v234_v36, %v233_v27  ;;  %v44_v34 = vld [vmem:[#allocation3 + $0x44] sm:$0xf]  ;;  %v45_v35 = vld [vmem:[#allocation3 + $0x48] sm:$0xf] }
  0x2f   :  { %1571 = vadd.xlane.f32.xlu0 %v1449_v41  ;;  %v216_v46 = vadd.f32 %v215_v38, %v214_v31  ;;  %v241_v47 = vrot.slane %v240_v39, 4  ;;  %v248_v48 = vrot.slane %v247_v40, 4  ;;  %v254_v49 = vsel %vm155_vm0, %v41_v33, 0.0 }
  0x30   :  { %v222_v50 = vrot.slane %v221_v43, 2  ;;  %v229_v51 = vrot.slane %v228_v44, 2  ;;  %v236_v52 = vrot.slane %v235_v45, 2  ;;  %v255_v53 = vrot.slane %v254_v49, 4 }
  0x31   :  { %v217_v54 = vrot.slane %v216_v46, 1  ;;  %v242_v55 = vadd.f32 %v241_v47, %v240_v39  ;;  %v249_v56 = vadd.f32 %v248_v48, %v247_v40  ;;  %v261_v57 = vsel %vm155_vm0, %v42_v42, 0.0  ;;  %v46_v47 = vld [vmem:[#allocation3 + $0x4c] sm:$0xf] }
  0x32   :  { %v223_v58 = vadd.f32 %v222_v50, %v221_v43  ;;  %v230_v59 = vadd.f32 %v229_v51, %v228_v44  ;;  %v237_v62 = vadd.f32 %v236_v52, %v235_v45  ;;  %v256_v63 = vadd.f32 %v255_v53, %v254_v49 }
  0x33   :  { %v218_v2 = vadd.f32 %v217_v54, %v216_v46  ;;  %v243_v5 = vrot.slane %v242_v55, 2  ;;  %v250_v6 = vrot.slane %v249_v56, 2  ;;  %v262_v7 = vrot.slane %v261_v57, 4 }
  0x34   :  { %v224_v8 = vrot.slane %v223_v58, 1  ;;  %v231_v9 = vrot.slane %v230_v59, 1  ;;  %v238_v10 = vrot.slane %v237_v62, 1  ;;  %v257_v11 = vrot.slane %v256_v63, 2 }
  0x35   :  { %v244_v12 = vadd.f32 %v243_v5, %v242_v55  ;;  %v251_v13 = vadd.f32 %v250_v6, %v249_v56  ;;  %v263_v14 = vadd.f32 %v262_v7, %v261_v57  ;;  %v2164_v15 = vmul.f32 0.25, %v218_v2  ;;  %v47_v56 = vld [vmem:[#allocation3 + $0x50] sm:$0xf]  ;;  %v48_v6 = vld [vmem:[#allocation3 + $0x54] sm:$0xf] }
  0x36   :  { %v225_v16 = vadd.f32 %v224_v8, %v223_v58  ;;  %v232_v17 = vadd.f32 %v231_v9, %v230_v59  ;;  %v239_v20 = vadd.f32 %v238_v10, %v237_v62  ;;  %v258_v21 = vadd.f32 %v257_v11, %v256_v63  ;;  %v49_v7 = vld [vmem:[#allocation3 + $0x58] sm:$0xf] }
  0x37   :  { %v245_v23 = vrot.slane %v244_v12, 1  ;;  %v252_v24 = vrot.slane %v251_v13, 1  ;;  %v264_v25 = vrot.slane %v263_v14, 2  ;;  %v1188_v26 = vmul.f32 %v2164_v15, %v2164_v15 }
  0x38   :  { %v259_v27 = vrot.slane %v258_v21, 1  ;;  %v2168_v28 = vmul.f32 0.25, %v225_v16  ;;  %v2170_v29 = vmul.f32 0.25, %v232_v17  ;;  %v2172_v30 = vmul.f32 0.25, %v239_v20  ;;  %v50_v16 = vld [vmem:[#allocation3 + $0x5c] sm:$0xf] }
  0x39   :  { %v246_v31 = vadd.f32 %v245_v23, %v244_v12  ;;  %v253_v32 = vadd.f32 %v252_v24, %v251_v13  ;;  %v265_v33 = vadd.f32 %v264_v25, %v263_v14  ;;  %v268_v36 = vsel %vm155_vm0, %v43_v22, 0.0 }
  0x3a   :  { %v260_v37 = vadd.f32 %v259_v27, %v258_v21  ;;  %v1189_v38 = vmul.f32 %v2168_v28, %v2168_v28  ;;  %v1190_v39 = vmul.f32 %v2170_v29, %v2170_v29  ;;  %v1191_v40 = vmul.f32 %v2172_v30, %v2172_v30 }
  0x3b   :  { %v266_v41 = vrot.slane %v265_v33, 1  ;;  %v2181_v42 = vmul.f32 0.25, %v246_v31  ;;  %v2183_v43 = vmul.f32 0.25, %v253_v32  ;;  %v269_v44 = vrot.slane %v268_v36, 4 }
  0x3c   :  { %v2185_v45 = vmul.f32 0.25, %v260_v37  ;;  %v1450_v46 = vsel %vm1436_vm1, %v1189_v38, %v1188_v26  ;;  %v275_v48 = vsel %vm155_vm0, %v44_v34, 0.0  ;;  %v282_v49 = vsel %vm155_vm0, %v45_v35, 0.0 }
  0x3d   :  { %v267_v50 = vadd.f32 %v266_v41, %v265_v33  ;;  %v1192_v51 = vmul.f32 %v2181_v42, %v2181_v42  ;;  %v1193_v52 = vmul.f32 %v2183_v43, %v2183_v43  ;;  %v1451_v53 = vsel %vm1438_vm2, %v1190_v39, %v1450_v46 }
  0x3e   :  { %v1194_v54 = vmul.f32 %v2185_v45, %v2185_v45  ;;  %v1452_v55 = vsel %vm1440_vm3, %v1191_v40, %v1451_v53  ;;  %v270_v57 = vadd.f32 %v269_v44, %v268_v36  ;;  %v276_v58 = vrot.slane %v275_v48, 4 }
  0x3f   :  { %v2198_v59 = vmul.f32 0.25, %v267_v50  ;;  %v1453_v62 = vsel %vm1442_vm4, %v1192_v51, %v1452_v55  ;;  %v283_v63 = vrot.slane %v282_v49, 4  ;;  %v289_v2 = vsel %vm155_vm0, %v46_v47, 0.0 }
  0x40   :  { %v1454_v5 = vsel %vm1444_vm5, %v1193_v52, %v1453_v62  ;;  %v271_v8 = vrot.slane %v270_v57, 2  ;;  %v277_v9 = vadd.f32 %v276_v58, %v275_v48  ;;  %v290_v10 = vrot.slane %v289_v2, 4 }
  0x41   :  { %v1195_v11 = vmul.f32 %v2198_v59, %v2198_v59  ;;  %v1455_v12 = vsel %vm1446_vm6, %v1194_v54, %v1454_v5  ;;  %v284_v13 = vadd.f32 %v283_v63, %v282_v49  ;;  %v296_v14 = vsel %vm155_vm0, %v47_v56, 0.0 }
  0x42   :  { %v272_v17 = vadd.f32 %v271_v8, %v270_v57  ;;  %v278_v20 = vrot.slane %v277_v9, 2  ;;  %v291_v21 = vadd.f32 %v290_v10, %v289_v2  ;;  %v297_v22 = vrot.slane %v296_v14, 4  ;;  %v51_v57 = vld [vmem:[#allocation3 + $0x60] sm:$0xf] }
  0x43   :  { %v1456_v23 = vsel %vm1448_vm7, %v1195_v11, %v1455_v12  ;;  %v285_v24 = vrot.slane %v284_v13, 2  ;;  %v303_v25 = vsel %vm155_vm0, %v48_v6, 0.0  ;;  %v310_v26 = vsel %vm155_vm0, %v49_v7, 0.0 }
  0x44   :  { %1573 = vadd.xlane.f32.xlu0 %v1456_v23  ;;  %v273_v27 = vrot.slane %v272_v17, 1  ;;  %v279_v31 = vadd.f32 %v278_v20, %v277_v9  ;;  %v292_v32 = vrot.slane %v291_v21, 2  ;;  %v298_v33 = vadd.f32 %v297_v22, %v296_v14  ;;  %v52_v20 = vld [vmem:[#allocation3 + $0x64] sm:$0xf] }
  0x45   :  { %v286_v34 = vadd.f32 %v285_v24, %v284_v13  ;;  %v304_v35 = vrot.slane %v303_v25, 4  ;;  %v311_v36 = vrot.slane %v310_v26, 4  ;;  %v317_v37 = vsel %vm155_vm0, %v50_v16, 0.0 }
  0x46   :  { %v274_v38 = vadd.f32 %v273_v27, %v272_v17  ;;  %v280_v39 = vrot.slane %v279_v31, 1  ;;  %v293_v40 = vadd.f32 %v292_v32, %v291_v21  ;;  %v299_v41 = vrot.slane %v298_v33, 2  ;;  %v53_v32 = vld [vmem:[#allocation3 + $0x68] sm:$0xf] }
  0x47   :  { %v287_v44 = vrot.slane %v286_v34, 1  ;;  %v305_v46 = vadd.f32 %v304_v35, %v303_v25  ;;  %v312_v47 = vadd.f32 %v311_v36, %v310_v26  ;;  %v318_v48 = vrot.slane %v317_v37, 4 }
  0x48   :  { %v281_v49 = vadd.f32 %v280_v39, %v279_v31  ;;  %v294_v50 = vrot.slane %v293_v40, 1  ;;  %v300_v51 = vadd.f32 %v299_v41, %v298_v33  ;;  %v2211_v52 = vmul.f32 0.25, %v274_v38  ;;  %v54_v33 = vld [vmem:[#allocation3 + $0x6c] sm:$0xf]  ;;  %v55_v41 = vld [vmem:[#allocation3 + $0x70] sm:$0xf] }
  0x49   :  { %v288_v53 = vadd.f32 %v287_v44, %v286_v34  ;;  %v306_v54 = vrot.slane %v305_v46, 2  ;;  %v313_v55 = vrot.slane %v312_v47, 2  ;;  %v319_v56 = vadd.f32 %v318_v48, %v317_v37 }
  0x4a   :  { %v295_v58 = vadd.f32 %v294_v50, %v293_v40  ;;  %v301_v62 = vrot.slane %v300_v51, 1  ;;  %v2213_v63 = vmul.f32 0.25, %v281_v49  ;;  %v1196_v2 = vmul.f32 %v2211_v52, %v2211_v52 }
  0x4b   :  { %v307_v5 = vadd.f32 %v306_v54, %v305_v46  ;;  %v314_v6 = vadd.f32 %v313_v55, %v312_v47  ;;  %v320_v7 = vrot.slane %v319_v56, 2  ;;  %v2217_v8 = vmul.f32 0.25, %v288_v53  ;;  %v56_v55 = vld [vmem:[#allocation3 + $0x74] sm:$0xf] }
  0x4c   :  { %v302_v9 = vadd.f32 %v301_v62, %v300_v51  ;;  %v2219_v10 = vmul.f32 0.25, %v295_v58  ;;  %v1197_v11 = vmul.f32 %v2213_v63, %v2213_v63  ;;  %v324_v12 = vsel %vm155_vm0, %v51_v57, 0.0 }
  0x4d   :  { %v308_v13 = vrot.slane %v307_v5, 1  ;;  %v315_v14 = vrot.slane %v314_v6, 1  ;;  %v321_v16 = vadd.f32 %v320_v7, %v319_v56  ;;  %v1198_v17 = vmul.f32 %v2217_v8, %v2217_v8 }
  0x4e   :  { %v2226_v21 = vmul.f32 0.25, %v302_v9  ;;  %v1199_v22 = vmul.f32 %v2219_v10, %v2219_v10  ;;  %v1457_v23 = vsel %vm1436_vm1, %v1197_v11, %v1196_v2  ;;  %v325_v24 = vrot.slane %v324_v12, 4  ;;  %v57_v11 = vld [vmem:[#allocation3 + $0x78] sm:$0xf] }
  0x4f   :  { %v309_v25 = vadd.f32 %v308_v13, %v307_v5  ;;  %v316_v26 = vadd.f32 %v315_v14, %v314_v6  ;;  %v322_v27 = vrot.slane %v321_v16, 1  ;;  %v1458_v31 = vsel %vm1438_vm2, %v1198_v17, %v1457_v23 }
  0x50   :  { %v1200_v34 = vmul.f32 %v2226_v21, %v2226_v21  ;;  %v1459_v35 = vsel %vm1440_vm3, %v1199_v22, %v1458_v31  ;;  %v326_v36 = vadd.f32 %v325_v24, %v324_v12  ;;  %v331_v37 = vsel %vm155_vm0, %v52_v20, 0.0  ;;  %v58_v12 = vld [vmem:[#allocation3 + $0x7c] sm:$0xf] }
  0x51   :  { %v323_v38 = vadd.f32 %v322_v27, %v321_v16  ;;  %v2236_v39 = vmul.f32 0.25, %v309_v25  ;;  %v2238_v40 = vmul.f32 0.25, %v316_v26  ;;  %v332_v44 = vrot.slane %v331_v37, 4 }
  0x52   :  { %v1460_v46 = vsel %vm1442_vm4, %v1200_v34, %v1459_v35  ;;  %v327_v47 = vrot.slane %v326_v36, 2  ;;  %v338_v48 = vsel %vm155_vm0, %v53_v32, 0.0  ;;  %v345_v49 = vsel %vm155_vm0, %v54_v33, 0.0 }
  0x53   :  { %v2243_v50 = vmul.f32 0.25, %v323_v38  ;;  %v1201_v51 = vmul.f32 %v2236_v39, %v2236_v39  ;;  %v1202_v53 = vmul.f32 %v2238_v40, %v2238_v40  ;;  %v333_v54 = vadd.f32 %v332_v44, %v331_v37 }
  0x54   :  { %v328_v56 = vadd.f32 %v327_v47, %v326_v36  ;;  %v339_v57 = vrot.slane %v338_v48, 4  ;;  %v346_v58 = vrot.slane %v345_v49, 4  ;;  %v352_v62 = vsel %vm155_vm0, %v55_v41, 0.0 }
  0x55   :  { %3228 = vst [vmem:[#allocation9_spill] sm:$0xff] %v2243_v50  ;;  %v1203_v2 = vmul.f32 %v2243_v50, %v2243_v50  ;;  %v1461_v5 = vsel %vm1444_vm5, %v1201_v51, %v1460_v46  ;;  %v334_v6 = vrot.slane %v333_v54, 2  ;;  %v353_v7 = vrot.slane %v352_v62, 4 }
  0x56   :  { %v1462_v9 = vsel %vm1446_vm6, %v1202_v53, %v1461_v5  ;;  %v329_v13 = vrot.slane %v328_v56, 1  ;;  %v340_v14 = vadd.f32 %v339_v57, %v338_v48  ;;  %v347_v16 = vadd.f32 %v346_v58, %v345_v49 }
  0x57   :  { %v1463_v17 = vsel %vm1448_vm7, %v1203_v2, %v1462_v9  ;;  %v335_v20 = vadd.f32 %v334_v6, %v333_v54  ;;  %v354_v22 = vadd.f32 %v353_v7, %v352_v62  ;;  %v359_v23 = vsel %vm155_vm0, %v56_v55, 0.0  ;;  %v59_v54 = vld [vmem:[#allocation3 + $0x80] sm:$0xf] }
  0x58   :  { %1575 = vadd.xlane.f32.xlu1 %v1463_v17  ;;  %v330_v24 = vadd.f32 %v329_v13, %v328_v56  ;;  %v341_v25 = vrot.slane %v340_v14, 2  ;;  %v348_v26 = vrot.slane %v347_v16, 2  ;;  %v360_v27 = vrot.slane %v359_v23, 4 }
  0x59   :  { %v336_v31 = vrot.slane %v335_v20, 1  ;;  %v355_v32 = vrot.slane %v354_v22, 2  ;;  %v366_v33 = vsel %vm155_vm0, %v57_v11, 0.0  ;;  %v373_v34 = vsel %vm155_vm0, %v58_v12, 0.0 }
  0x5a   :  { %v342_v35 = vadd.f32 %v341_v25, %v340_v14  ;;  %v349_v36 = vadd.f32 %v348_v26, %v347_v16  ;;  %v361_v37 = vadd.f32 %v360_v27, %v359_v23  ;;  %v367_v38 = vrot.slane %v366_v33, 4 }
  0x5b   :  { %v337_v41 = vadd.f32 %v336_v31, %v335_v20  ;;  %v356_v44 = vadd.f32 %v355_v32, %v354_v22  ;;  %v374_v46 = vrot.slane %v373_v34, 4  ;;  %v2258_v47 = vmul.f32 0.25, %v330_v24  ;;  %v60_v20 = vld [vmem:[#allocation3 + $0x84] sm:$0xf] }
  0x5c   :  { %v343_v48 = vrot.slane %v342_v35, 1  ;;  %v350_v49 = vrot.slane %v349_v36, 1  ;;  %v362_v51 = vrot.slane %v361_v37, 2  ;;  %v368_v53 = vadd.f32 %v367_v38, %v366_v33  ;;  %v61_v33 = vld [vmem:[#allocation3 + $0x88] sm:$0xf] }
  0x5d   :  { %v357_v55 = vrot.slane %v356_v44, 1  ;;  %v375_v56 = vadd.f32 %v374_v46, %v373_v34  ;;  %v2260_v57 = vmul.f32 0.25, %v337_v41  ;;  %v1204_v58 = vmul.f32 %v2258_v47, %v2258_v47  ;;  %v62_v46 = vld [vmem:[#allocation3 + $0x8c] sm:$0xf] }
  0x5e   :  { %v344_v62 = vadd.f32 %v343_v48, %v342_v35  ;;  %v351_v2 = vadd.f32 %v350_v49, %v349_v36  ;;  %v363_v5 = vadd.f32 %v362_v51, %v361_v37  ;;  %v369_v6 = vrot.slane %v368_v53, 2 }
  0x5f   :  { %v358_v7 = vadd.f32 %v357_v55, %v356_v44  ;;  %v376_v9 = vrot.slane %v375_v56, 2  ;;  %v1205_v11 = vmul.f32 %v2260_v57, %v2260_v57  ;;  %v380_v12 = vsel %vm155_vm0, %v59_v54, 0.0 }
  0x60   :  { %v364_v13 = vrot.slane %v363_v5, 1  ;;  %v370_v14 = vadd.f32 %v369_v6, %v368_v53  ;;  %v2267_v16 = vmul.f32 0.25, %v344_v62  ;;  %v2269_v17 = vmul.f32 0.25, %v351_v2  ;;  %v63_v62 = vld [vmem:[#allocation3 + $0x90] sm:$0xf] }
  0x61   :  { %v377_v22 = vadd.f32 %v376_v9, %v375_v56  ;;  %v2271_v23 = vmul.f32 0.25, %v358_v7  ;;  %v1464_v24 = vsel %vm1436_vm1, %v1205_v11, %v1204_v58  ;;  %v381_v25 = vrot.slane %v380_v12, 4 }
  0x62   :  { %v365_v26 = vadd.f32 %v364_v13, %v363_v5  ;;  %v371_v27 = vrot.slane %v370_v14, 1  ;;  %v1206_v31 = vmul.f32 %v2267_v16, %v2267_v16  ;;  %v1207_v32 = vmul.f32 %v2269_v17, %v2269_v17  ;;  %v64_v13 = vld [vmem:[#allocation3 + $0x94] sm:$0xf] }
  0x63   :  { %v378_v34 = vrot.slane %v377_v22, 1  ;;  %v1208_v35 = vmul.f32 %v2271_v23, %v2271_v23  ;;  %v382_v36 = vadd.f32 %v381_v25, %v380_v12  ;;  %v387_v37 = vsel %vm155_vm0, %v60_v20, 0.0 }
  0x64   :  { %v372_v38 = vadd.f32 %v371_v27, %v370_v14  ;;  %v2281_v41 = vmul.f32 0.25, %v365_v26  ;;  %v1465_v44 = vsel %vm1438_vm2, %v1206_v31, %v1464_v24  ;;  %v388_v48 = vrot.slane %v387_v37, 4  ;;  %v65_v31 = vld [vmem:[#allocation3 + $0x98] sm:$0xf] }
  0x65   :  { %v379_v49 = vadd.f32 %v378_v34, %v377_v22  ;;  %v1466_v51 = vsel %vm1440_vm3, %v1207_v32, %v1465_v44  ;;  %v383_v53 = vrot.slane %v382_v36, 2  ;;  %v394_v54 = vsel %vm155_vm0, %v61_v33, 0.0  ;;  %v66_v32 = vld [vmem:[#allocation3 + $0x9c] sm:$0xf] }
  0x66   :  { %3229 = vst [vmem:[#allocation10_spill] sm:$0xff] %v2281_v41  ;;  %v2286_v55 = vmul.f32 0.25, %v372_v38  ;;  %v1209_v56 = vmul.f32 %v2281_v41, %v2281_v41  ;;  %v1467_v58 = vsel %vm1442_vm4, %v1208_v35, %v1466_v51  ;;  %v389_v2 = vadd.f32 %v388_v48, %v387_v37 }
  0x67   :  { %v2291_v5 = vmul.f32 0.25, %v379_v49  ;;  %v384_v6 = vadd.f32 %v383_v53, %v382_v36  ;;  %v395_v7 = vrot.slane %v394_v54, 4  ;;  %v401_v9 = vsel %vm155_vm0, %v62_v46, 0.0 }
  0x68   :  { %3230 = vst [vmem:[#allocation11_spill] sm:$0xff] %v2286_v55  ;;  %v1210_v11 = vmul.f32 %v2286_v55, %v2286_v55  ;;  %v1468_v12 = vsel %vm1444_vm5, %v1209_v56, %v1467_v58  ;;  %v390_v14 = vrot.slane %v389_v2, 2  ;;  %v402_v20 = vrot.slane %v401_v9, 4 }
  0x69   :  { %3231 = vst [vmem:[#allocation12_spill] sm:$0xff] %v2291_v5  ;;  %v1211_v22 = vmul.f32 %v2291_v5, %v2291_v5  ;;  %v385_v24 = vrot.slane %v384_v6, 1  ;;  %v396_v25 = vadd.f32 %v395_v7, %v394_v54  ;;  %v408_v26 = vsel %vm155_vm0, %v63_v62, 0.0 }
  0x6a   :  { %v1469_v27 = vsel %vm1446_vm6, %v1210_v11, %v1468_v12  ;;  %v391_v33 = vadd.f32 %v390_v14, %v389_v2  ;;  %v403_v34 = vadd.f32 %v402_v20, %v401_v9  ;;  %v409_v35 = vrot.slane %v408_v26, 4 }
  0x6b   :  { %v1470_v36 = vsel %vm1448_vm7, %v1211_v22, %v1469_v27  ;;  %v386_v37 = vadd.f32 %v385_v24, %v384_v6  ;;  %v397_v38 = vrot.slane %v396_v25, 2  ;;  %v415_v44 = vsel %vm155_vm0, %v64_v13, 0.0  ;;  %v67_v6 = vld [vmem:[#allocation3 + $0xa0] sm:$0xf] }
  0x6c   :  { %1577 = vadd.xlane.f32.xlu1 %v1470_v36  ;;  %v392_v46 = vrot.slane %v391_v33, 1  ;;  %v404_v48 = vrot.slane %v403_v34, 2  ;;  %v410_v49 = vadd.f32 %v409_v35, %v408_v26  ;;  %v416_v51 = vrot.slane %v415_v44, 4 }
  0x6d   :  { %v398_v53 = vadd.f32 %v397_v38, %v396_v25  ;;  %v422_v54 = vsel %vm155_vm0, %v65_v31, 0.0  ;;  %v429_v56 = vsel %vm155_vm0, %v66_v32, 0.0  ;;  %v2305_v58 = vmul.f32 0.25, %v386_v37 }
  0x6e   :  { %v393_v62 = vadd.f32 %v392_v46, %v391_v33  ;;  %v405_v2 = vadd.f32 %v404_v48, %v403_v34  ;;  %v411_v7 = vrot.slane %v410_v49, 2  ;;  %v417_v9 = vadd.f32 %v416_v51, %v415_v44  ;;  %v68_v46 = vld [vmem:[#allocation3 + $0xa4] sm:$0xf] }
  0x6f   :  { %v399_v11 = vrot.slane %v398_v53, 1  ;;  %v423_v12 = vrot.slane %v422_v54, 4  ;;  %v430_v13 = vrot.slane %v429_v56, 4  ;;  %v1212_v14 = vmul.f32 %v2305_v58, %v2305_v58 }
  0x70   :  { %v406_v20 = vrot.slane %v405_v2, 1  ;;  %v412_v22 = vadd.f32 %v411_v7, %v410_v49  ;;  %v418_v24 = vrot.slane %v417_v9, 2  ;;  %v2309_v25 = vmul.f32 0.25, %v393_v62 }
  0x71   :  { %v400_v26 = vadd.f32 %v399_v11, %v398_v53  ;;  %v424_v27 = vadd.f32 %v423_v12, %v422_v54  ;;  %v431_v31 = vadd.f32 %v430_v13, %v429_v56  ;;  %v436_v32 = vsel %vm155_vm0, %v67_v6, 0.0  ;;  %v69_v12 = vld [vmem:[#allocation3 + $0xa8] sm:$0xf] }
  0x72   :  { %v407_v33 = vadd.f32 %v406_v20, %v405_v2  ;;  %v413_v34 = vrot.slane %v412_v22, 1  ;;  %v419_v35 = vadd.f32 %v418_v24, %v417_v9  ;;  %v1213_v36 = vmul.f32 %v2309_v25, %v2309_v25 }
  0x73   :  { %v425_v37 = vrot.slane %v424_v27, 2  ;;  %v432_v38 = vrot.slane %v431_v31, 2  ;;  %v2314_v44 = vmul.f32 0.25, %v400_v26  ;;  %v437_v48 = vrot.slane %v436_v32, 4 }
  0x74   :  { %v414_v49 = vadd.f32 %v413_v34, %v412_v22  ;;  %v420_v51 = vrot.slane %v419_v35, 1  ;;  %v2316_v62 = vmul.f32 0.25, %v407_v33  ;;  %v1471_v53 = vsel %vm1436_vm1, %v1213_v36, %v1212_v14 }
  0x75   :  { %v426_v54 = vadd.f32 %v425_v37, %v424_v27  ;;  %v433_v56 = vadd.f32 %v432_v38, %v431_v31  ;;  %v1214_v2 = vmul.f32 %v2314_v44, %v2314_v44  ;;  %v438_v7 = vadd.f32 %v437_v48, %v436_v32  ;;  %v70_v32 = vld [vmem:[#allocation3 + $0xac] sm:$0xf]  ;;  %v71_v48 = vld [vmem:[#allocation3 + $0xb0] sm:$0xf] }
  0x76   :  { %3232 = vst [vmem:[#allocation13_spill] sm:$0xff] %v2316_v62  ;;  %v421_v9 = vadd.f32 %v420_v51, %v419_v35  ;;  %v2321_v6 = vmul.f32 0.25, %v414_v49  ;;  %v1215_v11 = vmul.f32 %v2316_v62, %v2316_v62  ;;  %v443_v13 = vsel %vm155_vm0, %v68_v46, 0.0 }
  0x77   :  { %v427_v20 = vrot.slane %v426_v54, 1  ;;  %v434_v22 = vrot.slane %v433_v56, 1  ;;  %v1472_v24 = vsel %vm1438_vm2, %v1214_v2, %v1471_v53  ;;  %v439_v14 = vrot.slane %v438_v7, 2 }
  0x78   :  { %3233 = vst [vmem:[#allocation14_spill] sm:$0xff] %v2321_v6  ;;  %v2327_v26 = vmul.f32 0.25, %v421_v9  ;;  %v1216_v27 = vmul.f32 %v2321_v6, %v2321_v6  ;;  %v1473_v31 = vsel %vm1440_vm3, %v1215_v11, %v1472_v24  ;;  %v444_v33 = vrot.slane %v443_v13, 4  ;;  %v72_v9 = vld [vmem:[#allocation3 + $0xb4] sm:$0xf] }
  0x79   :  { %v428_v34 = vadd.f32 %v427_v20, %v426_v54  ;;  %v435_v35 = vadd.f32 %v434_v22, %v433_v56  ;;  %v440_v36 = vadd.f32 %v439_v14, %v438_v7  ;;  %v450_v37 = vsel %vm155_vm0, %v69_v12, 0.0  ;;  %v73_v7 = vld [vmem:[#allocation3 + $0xb8] sm:$0xf]  ;;  %v74_v12 = vld [vmem:[#allocation3 + $0xbc] sm:$0xf] }
  0x7a   :  { %3234 = vst [vmem:[#allocation15_spill] sm:$0xff] %v2327_v26  ;;  %v1217_v38 = vmul.f32 %v2327_v26, %v2327_v26  ;;  %v1474_v46 = vsel %vm1442_vm4, %v1216_v27, %v1473_v31  ;;  %v445_v49 = vadd.f32 %v444_v33, %v443_v13  ;;  %v451_v51 = vrot.slane %v450_v37, 4 }
  0x7b   :  { %v2336_v53 = vmul.f32 0.25, %v428_v34  ;;  %v2338_v2 = vmul.f32 0.25, %v435_v35  ;;  %v441_v11 = vrot.slane %v440_v36, 1  ;;  %v457_v54 = vsel %vm155_vm0, %v70_v32, 0.0 }
  0x7c   :  { %v1475_v56 = vsel %vm1444_vm5, %v1217_v38, %v1474_v46  ;;  %v446_v20 = vrot.slane %v445_v49, 2  ;;  %v452_v22 = vadd.f32 %v451_v51, %v450_v37  ;;  %v458_v24 = vrot.slane %v457_v54, 4 }
  0x7d   :  { %3235 = vst [vmem:[#allocation16_spill] sm:$0xff] %v2336_v53  ;;  %3236 = vst [vmem:[#allocation17_spill] sm:$0xff] %v2338_v2  ;;  %v1218_v14 = vmul.f32 %v2336_v53, %v2336_v53  ;;  %v1219_v13 = vmul.f32 %v2338_v2, %v2338_v2  ;;  %v442_v27 = vadd.f32 %v441_v11, %v440_v36  ;;  %v464_v31 = vsel %vm155_vm0, %v71_v48, 0.0 }
  0x7e   :  { %v447_v33 = vadd.f32 %v446_v20, %v445_v49  ;;  %v453_v34 = vrot.slane %v452_v22, 2  ;;  %v459_v35 = vadd.f32 %v458_v24, %v457_v54  ;;  %v465_v32 = vrot.slane %v464_v31, 4 }
  0x7f   :  { %v1476_v38 = vsel %vm1446_vm6, %v1218_v14, %v1475_v56  ;;  %v471_v46 = vsel %vm155_vm0, %v72_v9, 0.0  ;;  %v478_v37 = vsel %vm155_vm0, %v73_v7, 0.0  ;;  %v485_v51 = vsel %vm155_vm0, %v74_v12, 0.0  ;;  %v75_v12 = vld [vmem:[#allocation3 + $0xc0] sm:$0xf] }
  0x80   :  { %v1477_v53 = vsel %vm1448_vm7, %v1219_v13, %v1476_v38  ;;  %v448_v5 = vrot.slane %v447_v33, 1  ;;  %v454_v26 = vadd.f32 %v453_v34, %v452_v22  ;;  %v460_v2 = vrot.slane %v459_v35, 2 }
  0x81   :  { %1579 = vadd.xlane.f32.xlu0 %v1477_v53  ;;  %v466_v36 = vadd.f32 %v465_v32, %v464_v31  ;;  %v472_v48 = vrot.slane %v471_v46, 4  ;;  %v479_v49 = vrot.slane %v478_v37, 4  ;;  %v486_v11 = vrot.slane %v485_v51, 4 }
  0x82   :  { %v449_v54 = vadd.f32 %v448_v5, %v447_v33  ;;  %v455_v20 = vrot.slane %v454_v26, 1  ;;  %v461_v24 = vadd.f32 %v460_v2, %v459_v35  ;;  %v2352_v56 = vmul.f32 0.25, %v442_v27 }
  0x83   :  { %v467_v9 = vrot.slane %v466_v36, 2  ;;  %v473_v14 = vadd.f32 %v472_v48, %v471_v46  ;;  %v480_v7 = vadd.f32 %v479_v49, %v478_v37  ;;  %v487_v55 = vadd.f32 %v486_v11, %v485_v51  ;;  %v76_v51 = vld [vmem:[#allocation3 + $0xc4] sm:$0xf] }
  0x84   :  { %v456_v6 = vadd.f32 %v455_v20, %v454_v26  ;;  %v462_v13 = vrot.slane %v461_v24, 1  ;;  %v2354_v38 = vmul.f32 0.25, %v449_v54  ;;  %v1220_v53 = vmul.f32 %v2352_v56, %v2352_v56 }
  0x85   :  { %v468_v22 = vadd.f32 %v467_v9, %v466_v36  ;;  %v474_v31 = vrot.slane %v473_v14, 2  ;;  %v481_v34 = vrot.slane %v480_v7, 2  ;;  %v488_v5 = vrot.slane %v487_v55, 2  ;;  %v77_v9 = vld [vmem:[#allocation3 + $0xc8] sm:$0xf] }
  0x86   :  { %v463_v33 = vadd.f32 %v462_v13, %v461_v24  ;;  %v2358_v2 = vmul.f32 0.25, %v456_v6  ;;  %v1221_v27 = vmul.f32 %v2354_v38, %v2354_v38  ;;  %v492_v35 = vsel %vm155_vm0, %v75_v12, 0.0 }
  0x87   :  { %v469_v32 = vrot.slane %v468_v22, 1  ;;  %v475_v26 = vadd.f32 %v474_v31, %v473_v14  ;;  %v482_v46 = vadd.f32 %v481_v34, %v480_v7  ;;  %v489_v37 = vadd.f32 %v488_v5, %v487_v55 }
  0x88   :  { %3237 = vst [vmem:[#allocation18_spill] sm:$0xff] %v2358_v2  ;;  %v2363_v48 = vmul.f32 0.25, %v463_v33  ;;  %v1222_v36 = vmul.f32 %v2358_v2, %v2358_v2  ;;  %v1478_v49 = vsel %vm1436_vm1, %v1221_v27, %v1220_v53  ;;  %v493_v11 = vrot.slane %v492_v35, 4  ;;  %v78_v53 = vld [vmem:[#allocation3 + $0xcc] sm:$0xf] }
  0x89   :  { %v470_v6 = vadd.f32 %v469_v32, %v468_v22  ;;  %v476_v54 = vrot.slane %v475_v26, 1  ;;  %v483_v20 = vrot.slane %v482_v46, 1  ;;  %v490_v24 = vrot.slane %v489_v37, 1 }
  0x8a   :  { %3238 = vst [vmem:[#allocation19_spill] sm:$0xff] %v2363_v48  ;;  %v1223_v12 = vmul.f32 %v2363_v48, %v2363_v48  ;;  %v1479_v14 = vsel %vm1438_vm2, %v1222_v36, %v1478_v49  ;;  %v494_v55 = vadd.f32 %v493_v11, %v492_v35  ;;  %v499_v7 = vsel %vm155_vm0, %v76_v51, 0.0 }
  0x8b   :  { %v477_v13 = vadd.f32 %v476_v54, %v475_v26  ;;  %v484_v31 = vadd.f32 %v483_v20, %v482_v46  ;;  %v491_v34 = vadd.f32 %v490_v24, %v489_v37  ;;  %v2372_v5 = vmul.f32 0.25, %v470_v6  ;;  %v79_v26 = vld [vmem:[#allocation3 + $0xd0] sm:$0xf]  ;;  %v80_v46 = vld [vmem:[#allocation3 + $0xd4] sm:$0xf] }
  0x8c   :  { %v1480_v22 = vsel %vm1440_vm3, %v1223_v12, %v1479_v14  ;;  %v495_v33 = vrot.slane %v494_v55, 2  ;;  %v500_v27 = vrot.slane %v499_v7, 4  ;;  %v506_v32 = vsel %vm155_vm0, %v77_v9, 0.0  ;;  %v81_v37 = vld [vmem:[#allocation3 + $0xd8] sm:$0xf] }
  0x8d   :  { %3239 = vst [vmem:[#allocation20_spill] sm:$0xff] %v2372_v5  ;;  %v2376_v41 = vmul.f32 0.25, %v477_v13  ;;  %v2378_v48 = vmul.f32 0.25, %v484_v31  ;;  %v2380_v36 = vmul.f32 0.25, %v491_v34  ;;  %v1224_v35 = vmul.f32 %v2372_v5, %v2372_v5 }
  0x8e   :  { %v496_v51 = vadd.f32 %v495_v33, %v494_v55  ;;  %v501_v49 = vadd.f32 %v500_v27, %v499_v7  ;;  %v507_v11 = vrot.slane %v506_v32, 4  ;;  %v513_v6 = vsel %vm155_vm0, %v78_v53, 0.0  ;;  %v82_v7 = vld [vmem:[#allocation3 + $0xdc] sm:$0xf] }
  0x8f   :  { %3240 = vst [vmem:[#allocation21_spill] sm:$0xff] %v2376_v41  ;;  %3241 = vst [vmem:[#allocation22_spill] sm:$0xff] %v2378_v48  ;;  %v1225_v54 = vmul.f32 %v2376_v41, %v2376_v41  ;;  %v1226_v20 = vmul.f32 %v2378_v48, %v2378_v48  ;;  %v1227_v24 = vmul.f32 %v2380_v36, %v2380_v36  ;;  %v514_v31 = vrot.slane %v513_v6, 4 }
  0x90   :  { %3242 = vst [vmem:[#allocation23_spill] sm:$0xff] %v2380_v36  ;;  %v1481_v9 = vsel %vm1442_vm4, %v1224_v35, %v1480_v22  ;;  %v497_v12 = vrot.slane %v496_v51, 1  ;;  %v502_v14 = vrot.slane %v501_v49, 2  ;;  %v508_v13 = vadd.f32 %v507_v11, %v506_v32 }
  0x91   :  { %v1482_v55 = vsel %vm1444_vm5, %v1225_v54, %v1481_v9  ;;  %v520_v34 = vsel %vm155_vm0, %v79_v26, 0.0  ;;  %v527_v53 = vsel %vm155_vm0, %v80_v46, 0.0  ;;  %v534_v33 = vsel %vm155_vm0, %v81_v37, 0.0 }
  0x92   :  { %v1483_v27 = vsel %vm1446_vm6, %v1226_v20, %v1482_v55  ;;  %v498_v48 = vadd.f32 %v497_v12, %v496_v51  ;;  %v503_v41 = vadd.f32 %v502_v14, %v501_v49  ;;  %v509_v36 = vrot.slane %v508_v13, 2 }
  0x93   :  { %v1484_v22 = vsel %vm1448_vm7, %v1227_v24, %v1483_v27  ;;  %v515_v35 = vadd.f32 %v514_v31, %v513_v6  ;;  %v521_v5 = vrot.slane %v520_v34, 4  ;;  %v528_v32 = vrot.slane %v527_v53, 4  ;;  %v83_v31 = vld [vmem:[#allocation3 + $0xe0] sm:$0xf] }
  0x94   :  { %1581 = vadd.xlane.f32.xlu1 %v1484_v22  ;;  %v504_v11 = vrot.slane %v503_v41, 1  ;;  %v510_v54 = vadd.f32 %v509_v36, %v508_v13  ;;  %v535_v9 = vrot.slane %v534_v33, 4  ;;  %v541_v26 = vsel %vm155_vm0, %v82_v7, 0.0 }
  0x95   :  { %v516_v2 = vrot.slane %v515_v35, 2  ;;  %v522_v46 = vadd.f32 %v521_v5, %v520_v34  ;;  %v529_v50 = vadd.f32 %v528_v32, %v527_v53  ;;  %v542_v37 = vrot.slane %v541_v26, 4 }
  0x96   :  { %v505_v62 = vadd.f32 %v504_v11, %v503_v41  ;;  %v511_v20 = vrot.slane %v510_v54, 1  ;;  %v536_v51 = vadd.f32 %v535_v9, %v534_v33  ;;  %v2399_v49 = vmul.f32 0.25, %v498_v48  ;;  %v84_v11 = vld [vmem:[#allocation3 + $0xe4] sm:$0xf] }
  0x97   :  { %v517_v12 = vadd.f32 %v516_v2, %v515_v35  ;;  %v523_v24 = vrot.slane %v522_v46, 2  ;;  %v530_v6 = vrot.slane %v529_v50, 2  ;;  %v543_v14 = vadd.f32 %v542_v37, %v541_v26 }
  0x98   :  { %3243 = vst [vmem:[#allocation24_spill] sm:$0xff] %v2399_v49  ;;  %v512_v55 = vadd.f32 %v511_v20, %v510_v54  ;;  %v537_v27 = vrot.slane %v536_v51, 2  ;;  %v2401_v36 = vmul.f32 0.25, %v505_v62  ;;  %v1228_v13 = vmul.f32 %v2399_v49, %v2399_v49 }
  0x99   :  { %v518_v5 = vrot.slane %v517_v12, 1  ;;  %v524_v7 = vadd.f32 %v523_v24, %v522_v46  ;;  %v531_v34 = vadd.f32 %v530_v6, %v529_v50  ;;  %v544_v41 = vrot.slane %v543_v14, 2  ;;  %v85_v24 = vld [vmem:[#allocation3 + $0xe8] sm:$0xf] }
  0x9a   :  { %3244 = vst [vmem:[#allocation25_spill] sm:$0xff] %v2401_v36  ;;  %v538_v53 = vadd.f32 %v537_v27, %v536_v51  ;;  %v2405_v33 = vmul.f32 0.25, %v512_v55  ;;  %v1229_v2 = vmul.f32 %v2401_v36, %v2401_v36  ;;  %v548_v48 = vsel %vm155_vm0, %v83_v31, 0.0 }
  0x9b   :  { %v519_v22 = vadd.f32 %v518_v5, %v517_v12  ;;  %v525_v35 = vrot.slane %v524_v7, 1  ;;  %v532_v32 = vrot.slane %v531_v34, 1  ;;  %v545_v62 = vadd.f32 %v544_v41, %v543_v14  ;;  %v87_v41 = vld [vmem:[#allocation3 + $0xf0] sm:$0xf] }
  0x9c   :  { %3245 = vst [vmem:[#allocation26_spill] sm:$0xff] %v2405_v33  ;;  %v539_v54 = vrot.slane %v538_v53, 1  ;;  %v1230_v9 = vmul.f32 %v2405_v33, %v2405_v33  ;;  %v1485_v50 = vsel %vm1436_vm1, %v1229_v2, %v1228_v13  ;;  %v549_v26 = vrot.slane %v548_v48, 4 }
  0x9d   :  { %v526_v46 = vadd.f32 %v525_v35, %v524_v7  ;;  %v533_v37 = vadd.f32 %v532_v32, %v531_v34  ;;  %v546_v20 = vrot.slane %v545_v62, 1  ;;  %v2413_v51 = vmul.f32 0.25, %v519_v22  ;;  %v86_v7 = vld [vmem:[#allocation3 + $0xec] sm:$0xf] }
  0x9e   :  { %v540_v6 = vadd.f32 %v539_v54, %v538_v53  ;;  %v1486_v12 = vsel %vm1438_vm2, %v1230_v9, %v1485_v50  ;;  %v550_v31 = vadd.f32 %v549_v26, %v548_v48  ;;  %v555_v14 = vsel %vm155_vm0, %v84_v11, 0.0  ;;  %v88_v54 = vld [vmem:[#allocation3 + $0xf4] sm:$0xf] }
  0x9f   :  { %3246 = vst [vmem:[#allocation27_spill] sm:$0xff] %v2413_v51  ;;  %v547_v55 = vadd.f32 %v546_v20, %v545_v62  ;;  %v2417_v27 = vmul.f32 0.25, %v526_v46  ;;  %v2419_v5 = vmul.f32 0.25, %v533_v37  ;;  %v1231_v13 = vmul.f32 %v2413_v51, %v2413_v51 }
  0xa0   :  { %v2423_v34 = vmul.f32 0.25, %v540_v6  ;;  %v551_v2 = vrot.slane %v550_v31, 2  ;;  %v556_v22 = vrot.slane %v555_v14, 4  ;;  %v562_v53 = vsel %vm155_vm0, %v85_v24, 0.0 }
  0xa1   :  { %3247 = vst [vmem:[#allocation28_spill] sm:$0xff] %v2417_v27  ;;  %3248 = vst [vmem:[#allocation29_spill] sm:$0xff] %v2419_v5  ;;  %v2426_v35 = vmul.f32 0.25, %v547_v55  ;;  %v1232_v48 = vmul.f32 %v2417_v27, %v2417_v27  ;;  %v1233_v32 = vmul.f32 %v2419_v5, %v2419_v5  ;;  %v1487_v62 = vsel %vm1440_vm3, %v1231_v13, %v1486_v12  ;;  %v89_v55 = vld [vmem:[#allocation3 + $0xf8] sm:$0xf] }
  0xa2   :  { %3249 = vst [vmem:[#allocation30_spill] sm:$0xff] %v2423_v34  ;;  %v1234_v11 = vmul.f32 %v2423_v34, %v2423_v34  ;;  %v552_v9 = vadd.f32 %v551_v2, %v550_v31  ;;  %v557_v50 = vadd.f32 %v556_v22, %v555_v14  ;;  %v563_v26 = vrot.slane %v562_v53, 4  ;;  %v90_v31 = vld [vmem:[#allocation3 + $0xfc] sm:$0xf] }
  0xa3   :  { %3250 = vst [vmem:[#allocation31_spill] sm:$0xff] %v2426_v35  ;;  %v1235_v46 = vmul.f32 %v2426_v35, %v2426_v35  ;;  %v1488_v37 = vsel %vm1442_vm4, %v1232_v48, %v1487_v62  ;;  %v569_v20 = vsel %vm155_vm0, %v86_v7, 0.0  ;;  %v576_v24 = vsel %vm155_vm0, %v87_v41, 0.0 }
  0xa4   :  { %v1489_v6 = vsel %vm1444_vm5, %v1233_v32, %v1488_v37  ;;  %v553_v12 = vrot.slane %v552_v9, 1  ;;  %v558_v13 = vrot.slane %v557_v50, 2  ;;  %v564_v5 = vadd.f32 %v563_v26, %v562_v53 }
  0xa5   :  { %v1490_v34 = vsel %vm1446_vm6, %v1234_v11, %v1489_v6  ;;  %v570_v14 = vrot.slane %v569_v20, 4  ;;  %v577_v2 = vrot.slane %v576_v24, 4  ;;  %v583_v22 = vsel %vm155_vm0, %v88_v54, 0.0 }
  0xa6   :  { %v1491_v35 = vsel %vm1448_vm7, %v1235_v46, %v1490_v34  ;;  %v554_v48 = vadd.f32 %v553_v12, %v552_v9  ;;  %v559_v62 = vadd.f32 %v558_v13, %v557_v50  ;;  %v565_v7 = vrot.slane %v564_v5, 2  ;;  %v91_v12 = vld [vmem:[#allocation3 + $0x100] sm:$0xf] }
  0xa7   :  { %1583 = vadd.xlane.f32.xlu0 %v1491_v35  ;;  %v571_v41 = vadd.f32 %v570_v14, %v569_v20  ;;  %v578_v27 = vadd.f32 %v577_v2, %v576_v24  ;;  %v584_v32 = vrot.slane %v583_v22, 4  ;;  %v590_v37 = vsel %vm155_vm0, %v89_v55, 0.0 }
  0xa8   :  { %v560_v51 = vrot.slane %v559_v62, 1  ;;  %v566_v53 = vadd.f32 %v565_v7, %v564_v5  ;;  %v591_v26 = vrot.slane %v590_v37, 4  ;;  %v597_v11 = vsel %vm155_vm0, %v90_v31, 0.0 }
  0xa9   :  { %v572_v6 = vrot.slane %v571_v41, 2  ;;  %v579_v33 = vrot.slane %v578_v27, 2  ;;  %v585_v36 = vadd.f32 %v584_v32, %v583_v22  ;;  %v598_v54 = vrot.slane %v597_v11, 4 }
  0xaa   :  { %v561_v49 = vadd.f32 %v560_v51, %v559_v62  ;;  %v567_v34 = vrot.slane %v566_v53, 1  ;;  %v592_v9 = vadd.f32 %v591_v26, %v590_v37  ;;  %v2446_v50 = vmul.f32 0.25, %v554_v48  ;;  %v92_v37 = vld [vmem:[#allocation3 + $0x104] sm:$0xf] }
  0xab   :  { %v573_v35 = vadd.f32 %v572_v6, %v571_v41  ;;  %v580_v46 = vadd.f32 %v579_v33, %v578_v27  ;;  %v586_v20 = vrot.slane %v585_v36, 2  ;;  %v599_v24 = vadd.f32 %v598_v54, %v597_v11 }
  0xac   :  { %3251 = vst [vmem:[#allocation32_spill] sm:$0xff] %v2446_v50  ;;  %v568_v55 = vadd.f32 %v567_v34, %v566_v53  ;;  %v593_v13 = vrot.slane %v592_v9, 2  ;;  %v2448_v5 = vmul.f32 0.25, %v561_v49  ;;  %v1236_v31 = vmul.f32 %v2446_v50, %v2446_v50 }
  0xad   :  { %v574_v14 = vrot.slane %v573_v35, 1  ;;  %v581_v2 = vrot.slane %v580_v46, 1  ;;  %v587_v22 = vadd.f32 %v586_v20, %v585_v36  ;;  %v600_v51 = vrot.slane %v599_v24, 2  ;;  %v93_v20 = vld [vmem:[#allocation3 + $0x108] sm:$0xf] }
  0xae   :  { %3252 = vst [vmem:[#allocation33_spill] sm:$0xff] %v2448_v5  ;;  %v594_v62 = vadd.f32 %v593_v13, %v592_v9  ;;  %v2452_v7 = vmul.f32 0.25, %v568_v55  ;;  %v1237_v33 = vmul.f32 %v2448_v5, %v2448_v5  ;;  %v604_v27 = vsel %vm155_vm0, %v91_v12, 0.0 }
  0xaf   :  { %v575_v48 = vadd.f32 %v574_v14, %v573_v35  ;;  %v582_v41 = vadd.f32 %v581_v2, %v580_v46  ;;  %v588_v32 = vrot.slane %v587_v22, 1  ;;  %v601_v49 = vadd.f32 %v600_v51, %v599_v24 }
  0xb0   :  { %3253 = vst [vmem:[#allocation34_spill] sm:$0xff] %v2452_v7  ;;  %v595_v53 = vrot.slane %v594_v62, 1  ;;  %v1238_v26 = vmul.f32 %v2452_v7, %v2452_v7  ;;  %v1492_v36 = vsel %vm1436_vm1, %v1237_v33, %v1236_v31  ;;  %v605_v11 = vrot.slane %v604_v27, 4 }
  0xb1   :  { %v589_v6 = vadd.f32 %v588_v32, %v587_v22  ;;  %v602_v54 = vrot.slane %v601_v49, 1  ;;  %v2460_v34 = vmul.f32 0.25, %v575_v48  ;;  %v2462_v9 = vmul.f32 0.25, %v582_v41  ;;  %v94_v22 = vld [vmem:[#allocation3 + $0x10c] sm:$0xf] }
  0xb2   :  { %v596_v12 = vadd.f32 %v595_v53, %v594_v62  ;;  %v1493_v35 = vsel %vm1438_vm2, %v1238_v26, %v1492_v36  ;;  %v606_v46 = vadd.f32 %v605_v11, %v604_v27  ;;  %v611_v24 = vsel %vm155_vm0, %v92_v37, 0.0  ;;  %v95_v53 = vld [vmem:[#allocation3 + $0x110] sm:$0xf]  ;;  %v96_v26 = vld [vmem:[#allocation3 + $0x114] sm:$0xf] }
  0xb3   :  { %3254 = vst [vmem:[#allocation35_spill] sm:$0xff] %v2460_v34  ;;  %3255 = vst [vmem:[#allocation36_spill] sm:$0xff] %v2462_v9  ;;  %v603_v55 = vadd.f32 %v602_v54, %v601_v49  ;;  %v2466_v13 = vmul.f32 0.25, %v589_v6  ;;  %v1239_v31 = vmul.f32 %v2460_v34, %v2460_v34  ;;  %v1240_v14 = vmul.f32 %v2462_v9, %v2462_v9 }
  0xb4   :  { %v2472_v2 = vmul.f32 0.25, %v596_v12  ;;  %v607_v51 = vrot.slane %v606_v46, 2  ;;  %v612_v33 = vrot.slane %v611_v24, 4  ;;  %v618_v62 = vsel %vm155_vm0, %v93_v20, 0.0  ;;  %v97_v20 = vld [vmem:[#allocation3 + $0x118] sm:$0xf] }
  0xb5   :  { %3256 = vst [vmem:[#allocation37_spill] sm:$0xff] %v2466_v13  ;;  %v2475_v48 = vmul.f32 0.25, %v603_v55  ;;  %v1241_v27 = vmul.f32 %v2466_v13, %v2466_v13  ;;  %v1494_v41 = vsel %vm1440_vm3, %v1239_v31, %v1493_v35  ;;  %v619_v32 = vrot.slane %v618_v62, 4  ;;  %v98_v31 = vld [vmem:[#allocation3 + $0x11c] sm:$0xf] }
  0xb6   :  { %3257 = vst [vmem:[#allocation38_spill] sm:$0xff] %v2472_v2  ;;  %v1242_v49 = vmul.f32 %v2472_v2, %v2472_v2  ;;  %v1495_v37 = vsel %vm1442_vm4, %v1240_v14, %v1494_v41  ;;  %v608_v36 = vadd.f32 %v607_v51, %v606_v46  ;;  %v613_v11 = vadd.f32 %v612_v33, %v611_v24 }
  0xb7   :  { %3258 = vst [vmem:[#allocation39_spill] sm:$0xff] %v2475_v48  ;;  %v1243_v6 = vmul.f32 %v2475_v48, %v2475_v48  ;;  %v1496_v54 = vsel %vm1444_vm5, %v1241_v27, %v1495_v37  ;;  %v620_v12 = vadd.f32 %v619_v32, %v618_v62  ;;  %v625_v55 = vsel %vm155_vm0, %v94_v22, 0.0 }
  0xb8   :  { %v1497_v35 = vsel %vm1446_vm6, %v1242_v49, %v1496_v54  ;;  %v609_v13 = vrot.slane %v608_v36, 1  ;;  %v614_v2 = vrot.slane %v613_v11, 2  ;;  %v626_v9 = vrot.slane %v625_v55, 4 }
  0xb9   :  { %v1498_v14 = vsel %vm1448_vm7, %v1243_v6, %v1497_v35  ;;  %v621_v41 = vrot.slane %v620_v12, 2  ;;  %v632_v46 = vsel %vm155_vm0, %v95_v53, 0.0  ;;  %v639_v24 = vsel %vm155_vm0, %v96_v26, 0.0 }
  0xba   :  { %1585 = vadd.xlane.f32.xlu1 %v1498_v14  ;;  %v610_v51 = vadd.f32 %v609_v13, %v608_v36  ;;  %v615_v33 = vadd.f32 %v614_v2, %v613_v11  ;;  %v627_v27 = vadd.f32 %v626_v9, %v625_v55  ;;  %v633_v62 = vrot.slane %v632_v46, 4  ;;  %v99_v36 = vld [vmem:[#allocation3 + $0x120] sm:$0xf] }
  0xbb   :  { %v622_v32 = vadd.f32 %v621_v41, %v620_v12  ;;  %v640_v22 = vrot.slane %v639_v24, 4  ;;  %v646_v49 = vsel %vm155_vm0, %v97_v20, 0.0  ;;  %v653_v37 = vsel %vm155_vm0, %v98_v31, 0.0 }
  0xbc   :  { %v616_v54 = vrot.slane %v615_v33, 1  ;;  %v628_v48 = vrot.slane %v627_v27, 2  ;;  %v634_v34 = vadd.f32 %v633_v62, %v632_v46  ;;  %v647_v6 = vrot.slane %v646_v49, 4 }
  0xbd   :  { %v623_v35 = vrot.slane %v622_v32, 1  ;;  %v641_v7 = vadd.f32 %v640_v22, %v639_v24  ;;  %v654_v53 = vrot.slane %v653_v37, 4  ;;  %v2493_v5 = vmul.f32 0.25, %v610_v51 }
  0xbe   :  { %v617_v26 = vadd.f32 %v616_v54, %v615_v33  ;;  %v629_v13 = vadd.f32 %v628_v48, %v627_v27  ;;  %v635_v2 = vrot.slane %v634_v34, 2  ;;  %v648_v9 = vadd.f32 %v647_v6, %v646_v49  ;;  %v100_v54 = vld [vmem:[#allocation3 + $0x124] sm:$0xf] }
  0xbf   :  { %3259 = vst [vmem:[#allocation40_spill] sm:$0xff] %v2493_v5  ;;  %v624_v11 = vadd.f32 %v623_v35, %v622_v32  ;;  %v642_v12 = vrot.slane %v641_v7, 2  ;;  %v655_v55 = vadd.f32 %v654_v53, %v653_v37  ;;  %v1244_v20 = vmul.f32 %v2493_v5, %v2493_v5 }
  0xc0   :  { %v630_v31 = vrot.slane %v629_v13, 1  ;;  %v636_v14 = vadd.f32 %v635_v2, %v634_v34  ;;  %v649_v41 = vrot.slane %v648_v9, 2  ;;  %v2497_v46 = vmul.f32 0.25, %v617_v26 }
  0xc1   :  { %v643_v24 = vadd.f32 %v642_v12, %v641_v7  ;;  %v656_v62 = vrot.slane %v655_v55, 2  ;;  %v2499_v51 = vmul.f32 0.25, %v624_v11  ;;  %v660_v48 = vsel %vm155_vm0, %v99_v36, 0.0  ;;  %v101_v36 = vld [vmem:[#allocation3 + $0x128] sm:$0xf] }
  0xc2   :  { %3260 = vst [vmem:[#allocation41_spill] sm:$0xff] %v2497_v46  ;;  %v631_v33 = vadd.f32 %v630_v31, %v629_v13  ;;  %v637_v27 = vrot.slane %v636_v14, 1  ;;  %v650_v22 = vadd.f32 %v649_v41, %v648_v9  ;;  %v1245_v32 = vmul.f32 %v2497_v46, %v2497_v46 }
  0xc3   :  { %3261 = vst [vmem:[#allocation42_spill] sm:$0xff] %v2499_v51  ;;  %v644_v49 = vrot.slane %v643_v24, 1  ;;  %v657_v37 = vadd.f32 %v656_v62, %v655_v55  ;;  %v1246_v34 = vmul.f32 %v2499_v51, %v2499_v51  ;;  %v661_v6 = vrot.slane %v660_v48, 4 }
  0xc4   :  { %v638_v35 = vadd.f32 %v637_v27, %v636_v14  ;;  %v651_v7 = vrot.slane %v650_v22, 1  ;;  %v2506_v53 = vmul.f32 0.25, %v631_v33  ;;  %v1499_v26 = vsel %vm1436_vm1, %v1245_v32, %v1244_v20  ;;  %v102_v33 = vld [vmem:[#allocation3 + $0x12c] sm:$0xf] }
  0xc5   :  { %v645_v2 = vadd.f32 %v644_v49, %v643_v24  ;;  %v658_v13 = vrot.slane %v657_v37, 1  ;;  %v1500_v9 = vsel %vm1438_vm2, %v1246_v34, %v1499_v26  ;;  %v662_v11 = vadd.f32 %v661_v6, %v660_v48 }
  0xc6   :  { %3262 = vst [vmem:[#allocation43_spill] sm:$0xff] %v2506_v53  ;;  %v652_v12 = vadd.f32 %v651_v7, %v650_v22  ;;  %v2510_v31 = vmul.f32 0.25, %v638_v35  ;;  %v1247_v55 = vmul.f32 %v2506_v53, %v2506_v53  ;;  %v667_v41 = vsel %vm155_vm0, %v100_v54, 0.0 }
  0xc7   :  { %v659_v14 = vadd.f32 %v658_v13, %v657_v37  ;;  %v2515_v62 = vmul.f32 0.25, %v645_v2  ;;  %v663_v27 = vrot.slane %v662_v11, 2  ;;  %v668_v20 = vrot.slane %v667_v41, 4  ;;  %v103_v37 = vld [vmem:[#allocation3 + $0x130] sm:$0xf] }
  0xc8   :  { %3263 = vst [vmem:[#allocation44_spill] sm:$0xff] %v2510_v31  ;;  %v2517_v24 = vmul.f32 0.25, %v652_v12  ;;  %v1248_v32 = vmul.f32 %v2510_v31, %v2510_v31  ;;  %v1501_v48 = vsel %vm1440_vm3, %v1247_v55, %v1500_v9  ;;  %v674_v22 = vsel %vm155_vm0, %v101_v36, 0.0  ;;  %v104_v36 = vld [vmem:[#allocation3 + $0x134] sm:$0xf] }
  0xc9   :  { %3264 = vst [vmem:[#allocation45_spill] sm:$0xff] %v2515_v62  ;;  %v2523_v49 = vmul.f32 0.25, %v659_v14  ;;  %v1249_v34 = vmul.f32 %v2515_v62, %v2515_v62  ;;  %v664_v54 = vadd.f32 %v663_v27, %v662_v11  ;;  %v669_v6 = vadd.f32 %v668_v20, %v667_v41  ;;  %v105_v12 = vld [vmem:[#allocation3 + $0x138] sm:$0xf] }
  0xca   :  { %3265 = vst [vmem:[#allocation46_spill] sm:$0xff] %v2517_v24  ;;  %v1250_v35 = vmul.f32 %v2517_v24, %v2517_v24  ;;  %v1502_v7 = vsel %vm1442_vm4, %v1248_v32, %v1501_v48  ;;  %v675_v26 = vrot.slane %v674_v22, 4  ;;  %v681_v2 = vsel %vm155_vm0, %v102_v33, 0.0  ;;  %v106_v48 = vld [vmem:[#allocation3 + $0x13c] sm:$0xf] }
  0xcb   :  { %3266 = vst [vmem:[#allocation47_spill] sm:$0xff] %v2523_v49  ;;  %v1251_v13 = vmul.f32 %v2523_v49, %v2523_v49  ;;  %v1503_v9 = vsel %vm1444_vm5, %v1249_v34, %v1502_v7  ;;  %v665_v55 = vrot.slane %v664_v54, 1  ;;  %v670_v14 = vrot.slane %v669_v6, 2 }
  0xcc   :  { %v1504_v11 = vsel %vm1446_vm6, %v1250_v35, %v1503_v9  ;;  %v676_v41 = vadd.f32 %v675_v26, %v674_v22  ;;  %v682_v27 = vrot.slane %v681_v2, 4  ;;  %v688_v20 = vsel %vm155_vm0, %v103_v37, 0.0 }
  0xcd   :  { %v1505_v32 = vsel %vm1448_vm7, %v1251_v13, %v1504_v11  ;;  %v666_v24 = vadd.f32 %v665_v55, %v664_v54  ;;  %v671_v33 = vadd.f32 %v670_v14, %v669_v6  ;;  %v689_v62 = vrot.slane %v688_v20, 4  ;;  %v107_v11 = vld [vmem:[#allocation3 + $0x140] sm:$0xf] }
  0xce   :  { %1587 = vadd.xlane.f32.xlu0 %v1505_v32  ;;  %v677_v49 = vrot.slane %v676_v41, 2  ;;  %v683_v31 = vadd.f32 %v682_v27, %v681_v2  ;;  %v695_v34 = vsel %vm155_vm0, %v104_v36, 0.0  ;;  %v702_v7 = vsel %vm155_vm0, %v105_v12, 0.0 }
  0xcf   :  { %v672_v53 = vrot.slane %v671_v33, 1  ;;  %v690_v51 = vadd.f32 %v689_v62, %v688_v20  ;;  %v696_v35 = vrot.slane %v695_v34, 4  ;;  %v703_v22 = vrot.slane %v702_v7, 4 }
  0xd0   :  { %v678_v26 = vadd.f32 %v677_v49, %v676_v41  ;;  %v684_v9 = vrot.slane %v683_v31, 2  ;;  %v709_v37 = vsel %vm155_vm0, %v106_v48, 0.0  ;;  %v2540_v13 = vmul.f32 0.25, %v666_v24 }
  0xd1   :  { %v673_v54 = vadd.f32 %v672_v53, %v671_v33  ;;  %v691_v6 = vrot.slane %v690_v51, 2  ;;  %v697_v55 = vadd.f32 %v696_v35, %v695_v34  ;;  %v704_v14 = vadd.f32 %v703_v22, %v702_v7 }
  0xd2   :  { %3267 = vst [vmem:[#allocation48_spill] sm:$0xff] %v2540_v13  ;;  %v679_v2 = vrot.slane %v678_v26, 1  ;;  %v685_v27 = vadd.f32 %v684_v9, %v683_v31  ;;  %v710_v36 = vrot.slane %v709_v37, 4  ;;  %v1252_v12 = vmul.f32 %v2540_v13, %v2540_v13 }
  0xd3   :  { %v692_v62 = vadd.f32 %v691_v6, %v690_v51  ;;  %v698_v20 = vrot.slane %v697_v55, 2  ;;  %v705_v32 = vrot.slane %v704_v14, 2  ;;  %v2544_v49 = vmul.f32 0.25, %v673_v54  ;;  %v108_v51 = vld [vmem:[#allocation3 + $0x144] sm:$0xf] }
  0xd4   :  { %v680_v41 = vadd.f32 %v679_v2, %v678_v26  ;;  %v686_v48 = vrot.slane %v685_v27, 1  ;;  %v711_v24 = vadd.f32 %v710_v36, %v709_v37  ;;  %v716_v53 = vsel %vm155_vm0, %v107_v11, 0.0 }
  0xd5   :  { %3268 = vst [vmem:[#allocation49_spill] sm:$0xff] %v2544_v49  ;;  %v693_v33 = vrot.slane %v692_v62, 1  ;;  %v699_v34 = vadd.f32 %v698_v20, %v697_v55  ;;  %v706_v7 = vadd.f32 %v705_v32, %v704_v14  ;;  %v1253_v31 = vmul.f32 %v2544_v49, %v2544_v49  ;;  %v109_v20 = vld [vmem:[#allocation3 + $0x148] sm:$0xf] }
  0xd6   :  { %v687_v35 = vadd.f32 %v686_v48, %v685_v27  ;;  %v712_v22 = vrot.slane %v711_v24, 2  ;;  %v2549_v9 = vmul.f32 0.25, %v680_v41  ;;  %v717_v6 = vrot.slane %v716_v53, 4 }
  0xd7   :  { %v694_v13 = vadd.f32 %v693_v33, %v692_v62  ;;  %v700_v54 = vrot.slane %v699_v34, 1  ;;  %v707_v46 = vrot.slane %v706_v7, 1  ;;  %v1506_v26 = vsel %vm1436_vm1, %v1253_v31, %v1252_v12  ;;  %v111_v31 = vld [vmem:[#allocation3 + $0x150] sm:$0xf] }
  0xd8   :  { %3269 = vst [vmem:[#allocation50_spill] sm:$0xff] %v2549_v9  ;;  %v713_v37 = vadd.f32 %v712_v22, %v711_v24  ;;  %v2552_v2 = vmul.f32 0.25, %v687_v35  ;;  %v1254_v55 = vmul.f32 %v2549_v9, %v2549_v9  ;;  %v718_v14 = vadd.f32 %v717_v6, %v716_v53 }
  0xd9   :  { %v701_v11 = vadd.f32 %v700_v54, %v699_v34  ;;  %v708_v36 = vadd.f32 %v707_v46, %v706_v7  ;;  %v2556_v27 = vmul.f32 0.25, %v694_v13  ;;  %v723_v32 = vsel %vm155_vm0, %v108_v51, 0.0  ;;  %v110_v46 = vld [vmem:[#allocation3 + $0x14c] sm:$0xf] }
  0xda   :  { %3270 = vst [vmem:[#allocation51_spill] sm:$0xff] %v2552_v2  ;;  %v714_v41 = vrot.slane %v713_v37, 1  ;;  %v1255_v62 = vmul.f32 %v2552_v2, %v2552_v2  ;;  %v1507_v12 = vsel %vm1438_vm2, %v1254_v55, %v1506_v26  ;;  %v719_v48 = vrot.slane %v718_v14, 2 }
  0xdb   :  { %3271 = vst [vmem:[#allocation52_spill] sm:$0xff] %v2556_v27  ;;  %v2562_v24 = vmul.f32 0.25, %v701_v11  ;;  %v2564_v33 = vmul.f32 0.25, %v708_v36  ;;  %v1256_v53 = vmul.f32 %v2556_v27, %v2556_v27  ;;  %v724_v13 = vrot.slane %v723_v32, 4  ;;  %v112_v11 = vld [vmem:[#allocation3 + $0x154] sm:$0xf] }
  0xdc   :  { %v715_v34 = vadd.f32 %v714_v41, %v713_v37  ;;  %v1508_v7 = vsel %vm1440_vm3, %v1255_v62, %v1507_v12  ;;  %v720_v35 = vadd.f32 %v719_v48, %v718_v14  ;;  %v730_v22 = vsel %vm155_vm0, %v109_v20, 0.0  ;;  %v113_v62 = vld [vmem:[#allocation3 + $0x158] sm:$0xf] }
  0xdd   :  { %3272 = vst [vmem:[#allocation53_spill] sm:$0xff] %v2562_v24  ;;  %3273 = vst [vmem:[#allocation54_spill] sm:$0xff] %v2564_v33  ;;  %v1257_v51 = vmul.f32 %v2562_v24, %v2562_v24  ;;  %v1258_v6 = vmul.f32 %v2564_v33, %v2564_v33  ;;  %v1509_v54 = vsel %vm1442_vm4, %v1256_v53, %v1508_v7  ;;  %v731_v37 = vrot.slane %v730_v22, 4 }
  0xde   :  { %v725_v26 = vadd.f32 %v724_v13, %v723_v32  ;;  %v2575_v55 = vmul.f32 0.25, %v715_v34  ;;  %v721_v36 = vrot.slane %v720_v35, 1  ;;  %v737_v41 = vsel %vm155_vm0, %v110_v46, 0.0  ;;  %v114_v34 = vld [vmem:[#allocation3 + $0x15c] sm:$0xf] }
  0xdf   :  { %v1510_v14 = vsel %vm1444_vm5, %v1257_v51, %v1509_v54  ;;  %v738_v12 = vrot.slane %v737_v41, 4  ;;  %v744_v48 = vsel %vm155_vm0, %v111_v31, 0.0  ;;  %v732_v13 = vadd.f32 %v731_v37, %v730_v22 }
  0xe0   :  { %3274 = vst [vmem:[#allocation55_spill] sm:$0xff] %v2575_v55  ;;  %v726_v20 = vrot.slane %v725_v26, 2  ;;  %v1259_v33 = vmul.f32 %v2575_v55, %v2575_v55  ;;  %v1511_v53 = vsel %vm1446_vm6, %v1258_v6, %v1510_v14  ;;  %v722_v32 = vadd.f32 %v721_v36, %v720_v35 }
  0xe1   :  { %v739_v24 = vadd.f32 %v738_v12, %v737_v41  ;;  %v745_v27 = vrot.slane %v744_v48, 4  ;;  %v751_v46 = vsel %vm155_vm0, %v112_v11, 0.0  ;;  %v733_v54 = vrot.slane %v732_v13, 2 }
  0xe2   :  { %v727_v7 = vadd.f32 %v726_v20, %v725_v26  ;;  %v1512_v51 = vsel %vm1448_vm7, %v1259_v33, %v1511_v53  ;;  %v752_v2 = vrot.slane %v751_v46, 4  ;;  %v758_v9 = vsel %vm155_vm0, %v113_v62, 0.0  ;;  %v115_v33 = vld [vmem:[#allocation3 + $0x160] sm:$0xf] }
  0xe3   :  { %1589 = vadd.xlane.f32.xlu1 %v1512_v51  ;;  %v740_v49 = vrot.slane %v739_v24, 2  ;;  %v746_v55 = vadd.f32 %v745_v27, %v744_v48  ;;  %v759_v5 = vrot.slane %v758_v9, 4  ;;  %v734_v6 = vadd.f32 %v733_v54, %v732_v13 }
  0xe4   :  { %v728_v31 = vrot.slane %v727_v7, 1  ;;  %v753_v35 = vadd.f32 %v752_v2, %v751_v46  ;;  %v765_v22 = vsel %vm155_vm0, %v114_v34, 0.0  ;;  %v2587_v26 = vmul.f32 0.25, %v722_v32 }
  0xe5   :  { %v741_v37 = vadd.f32 %v740_v49, %v739_v24  ;;  %v747_v11 = vrot.slane %v746_v55, 2  ;;  %v760_v41 = vadd.f32 %v759_v5, %v758_v9  ;;  %v735_v14 = vrot.slane %v734_v6, 1 }
  0xe6   :  { %3275 = vst [vmem:[#allocation56_spill] sm:$0xff] %v2587_v26  ;;  %v729_v36 = vadd.f32 %v728_v31, %v727_v7  ;;  %v754_v20 = vrot.slane %v753_v35, 2  ;;  %v766_v12 = vrot.slane %v765_v22, 4  ;;  %v1260_v62 = vmul.f32 %v2587_v26, %v2587_v26  ;;  %v116_v31 = vld [vmem:[#allocation3 + $0x164] sm:$0xf] }
  0xe7   :  { %v742_v53 = vrot.slane %v741_v37, 1  ;;  %v748_v27 = vadd.f32 %v747_v11, %v746_v55  ;;  %v761_v48 = vrot.slane %v760_v41, 2  ;;  %v736_v2 = vadd.f32 %v735_v14, %v734_v6 }
  0xe8   :  { %v2591_v13 = vmul.f32 0.25, %v729_v36  ;;  %v755_v34 = vadd.f32 %v754_v20, %v753_v35  ;;  %v767_v32 = vadd.f32 %v766_v12, %v765_v22  ;;  %v772_v7 = vsel %vm155_vm0, %v115_v33, 0.0  ;;  %v117_v12 = vld [vmem:[#allocation3 + $0x168] sm:$0xf] }
  0xe9   :  { %v743_v49 = vadd.f32 %v742_v53, %v741_v37  ;;  %v749_v24 = vrot.slane %v748_v27, 1  ;;  %v762_v5 = vadd.f32 %v761_v48, %v760_v41  ;;  %v2596_v54 = vmul.f32 0.25, %v736_v2 }
  0xea   :  { %3276 = vst [vmem:[#allocation57_spill] sm:$0xff] %v2591_v13  ;;  %v1261_v9 = vmul.f32 %v2591_v13, %v2591_v13  ;;  %v756_v46 = vrot.slane %v755_v34, 1  ;;  %v768_v51 = vrot.slane %v767_v32, 2  ;;  %v773_v55 = vrot.slane %v772_v7, 4 }
  0xeb   :  { %3277 = vst [vmem:[#allocation58_spill] sm:$0xff] %v2596_v54  ;;  %v750_v11 = vadd.f32 %v749_v24, %v748_v27  ;;  %v763_v36 = vrot.slane %v762_v5, 1  ;;  %v2598_v26 = vmul.f32 0.25, %v743_v49  ;;  %v1262_v37 = vmul.f32 %v2596_v54, %v2596_v54  ;;  %v118_v49 = vld [vmem:[#allocation3 + $0x16c] sm:$0xf] }
  0xec   :  { %v1513_v6 = vsel %vm1436_vm1, %v1261_v9, %v1260_v62  ;;  %v757_v35 = vadd.f32 %v756_v46, %v755_v34  ;;  %v769_v22 = vadd.f32 %v768_v51, %v767_v32  ;;  %v774_v41 = vadd.f32 %v773_v55, %v772_v7 }
  0xed   :  { %3278 = vst [vmem:[#allocation59_spill] sm:$0xff] %v2598_v26  ;;  %v764_v33 = vadd.f32 %v763_v36, %v762_v5  ;;  %v2603_v14 = vmul.f32 0.25, %v750_v11  ;;  %v1263_v20 = vmul.f32 %v2598_v26, %v2598_v26  ;;  %v779_v53 = vsel %vm155_vm0, %v116_v31, 0.0  ;;  %v119_v11 = vld [vmem:[#allocation3 + $0x170] sm:$0xf] }
  0xee   :  { %v770_v27 = vrot.slane %v769_v22, 1  ;;  %v2608_v48 = vmul.f32 0.25, %v757_v35  ;;  %v1514_v62 = vsel %vm1438_vm2, %v1262_v37, %v1513_v6  ;;  %v775_v2 = vrot.slane %v774_v41, 2  ;;  %v120_v36 = vld [vmem:[#allocation3 + $0x174] sm:$0xf] }
  0xef   :  { %3279 = vst [vmem:[#allocation60_spill] sm:$0xff] %v2603_v14  ;;  %v2611_v34 = vmul.f32 0.25, %v764_v33  ;;  %v1264_v32 = vmul.f32 %v2603_v14, %v2603_v14  ;;  %v1515_v7 = vsel %vm1440_vm3, %v1263_v20, %v1514_v62  ;;  %v780_v24 = vrot.slane %v779_v53, 4 }
  0xf0   :  { %3280 = vst [vmem:[#allocation61_spill] sm:$0xff] %v2608_v48  ;;  %v771_v5 = vadd.f32 %v770_v27, %v769_v22  ;;  %v1265_v9 = vmul.f32 %v2608_v48, %v2608_v48  ;;  %v776_v46 = vadd.f32 %v775_v2, %v774_v41  ;;  %v786_v51 = vsel %vm155_vm0, %v117_v12, 0.0  ;;  %v121_v27 = vld [vmem:[#allocation3 + $0x178] sm:$0xf]  ;;  %v122_v12 = vld [vmem:[#allocation3 + $0x17c] sm:$0xf] }
  0xf1   :  { %3281 = vst [vmem:[#allocation62_spill] sm:$0xff] %v2611_v34  ;;  %v1266_v31 = vmul.f32 %v2611_v34, %v2611_v34  ;;  %v1516_v55 = vsel %vm1442_vm4, %v1264_v32, %v1515_v7  ;;  %v781_v6 = vadd.f32 %v780_v24, %v779_v53  ;;  %v787_v35 = vrot.slane %v786_v51, 4 }
  0xf2   :  { %v2622_v37 = vmul.f32 0.25, %v771_v5  ;;  %v1517_v33 = vsel %vm1444_vm5, %v1265_v9, %v1516_v55  ;;  %v777_v22 = vrot.slane %v776_v46, 1  ;;  %v793_v20 = vsel %vm155_vm0, %v118_v49, 0.0 }
  0xf3   :  { %v1518_v41 = vsel %vm1446_vm6, %v1266_v31, %v1517_v33  ;;  %v782_v62 = vrot.slane %v781_v6, 2  ;;  %v788_v2 = vadd.f32 %v787_v35, %v786_v51  ;;  %v794_v34 = vrot.slane %v793_v20, 4 }
  0xf4   :  { %3282 = vst [vmem:[#allocation63_spill] sm:$0xff] %v2622_v37  ;;  %v1267_v32 = vmul.f32 %v2622_v37, %v2622_v37  ;;  %v778_v7 = vadd.f32 %v777_v22, %v776_v46  ;;  %v800_v53 = vsel %vm155_vm0, %v119_v11, 0.0  ;;  %v807_v24 = vsel %vm155_vm0, %v120_v36, 0.0 }
  0xf5   :  { %v783_v5 = vadd.f32 %v782_v62, %v781_v6  ;;  %v789_v9 = vrot.slane %v788_v2, 2  ;;  %v795_v55 = vadd.f32 %v794_v34, %v793_v20  ;;  %v801_v48 = vrot.slane %v800_v53, 4 }
  0xf6   :  { %v1519_v49 = vsel %vm1448_vm7, %v1267_v32, %v1518_v41  ;;  %v808_v31 = vrot.slane %v807_v24, 4  ;;  %v814_v33 = vsel %vm155_vm0, %v121_v27, 0.0  ;;  %v821_v51 = vsel %vm155_vm0, %v122_v12, 0.0  ;;  %v123_v41 = vld [vmem:[#allocation3 + $0x180] sm:$0xf] }
  0xf7   :  { %1591 = vadd.xlane.f32.xlu0 %v1519_v49  ;;  %v784_v35 = vrot.slane %v783_v5, 1  ;;  %v790_v14 = vadd.f32 %v789_v9, %v788_v2  ;;  %v796_v37 = vrot.slane %v795_v55, 2  ;;  %v802_v46 = vadd.f32 %v801_v48, %v800_v53 }
  0xf8   :  { %v809_v22 = vadd.f32 %v808_v31, %v807_v24  ;;  %v815_v11 = vrot.slane %v814_v33, 4  ;;  %v822_v26 = vrot.slane %v821_v51, 4  ;;  %v2634_v36 = vmul.f32 0.25, %v778_v7 }
  0xf9   :  { %v785_v6 = vadd.f32 %v784_v35, %v783_v5  ;;  %v791_v34 = vrot.slane %v790_v14, 1  ;;  %v797_v20 = vadd.f32 %v796_v37, %v795_v55  ;;  %v803_v62 = vrot.slane %v802_v46, 2 }
  0xfa   :  { %3283 = vst [vmem:[#allocation64_spill] sm:$0xff] %v2634_v36  ;;  %v810_v32 = vrot.slane %v809_v22, 2  ;;  %v816_v54 = vadd.f32 %v815_v11, %v814_v33  ;;  %v823_v27 = vadd.f32 %v822_v26, %v821_v51  ;;  %v1268_v12 = vmul.f32 %v2634_v36, %v2634_v36 }
  0xfb   :  { %v792_v49 = vadd.f32 %v791_v34, %v790_v14  ;;  %v798_v2 = vrot.slane %v797_v20, 1  ;;  %v804_v9 = vadd.f32 %v803_v62, %v802_v46  ;;  %v2638_v48 = vmul.f32 0.25, %v785_v6  ;;  %v124_v14 = vld [vmem:[#allocation3 + $0x184] sm:$0xf] }
  0xfc   :  { %v811_v53 = vadd.f32 %v810_v32, %v809_v22  ;;  %v817_v24 = vrot.slane %v816_v54, 2  ;;  %v824_v7 = vrot.slane %v823_v27, 2  ;;  %v828_v5 = vsel %vm155_vm0, %v123_v41, 0.0  ;;  %v125_v32 = vld [vmem:[#allocation3 + $0x188] sm:$0xf] }
  0xfd   :  { %3284 = vst [vmem:[#allocation65_spill] sm:$0xff] %v2638_v48  ;;  %v799_v31 = vadd.f32 %v798_v2, %v797_v20  ;;  %v805_v37 = vrot.slane %v804_v9, 1  ;;  %v2641_v55 = vmul.f32 0.25, %v792_v49  ;;  %v1269_v26 = vmul.f32 %v2638_v48, %v2638_v48 }
  0xfe   :  { %v812_v33 = vrot.slane %v811_v53, 1  ;;  %v818_v51 = vadd.f32 %v817_v24, %v816_v54  ;;  %v825_v35 = vadd.f32 %v824_v7, %v823_v27  ;;  %v829_v11 = vrot.slane %v828_v5, 4 }
  0xff   :  { %3285 = vst [vmem:[#allocation66_spill] sm:$0xff] %v2641_v55  ;;  %v806_v46 = vadd.f32 %v805_v37, %v804_v9  ;;  %v2645_v6 = vmul.f32 0.25, %v799_v31  ;;  %v1270_v22 = vmul.f32 %v2641_v55, %v2641_v55  ;;  %v1520_v34 = vsel %vm1436_vm1, %v1269_v26, %v1268_v12  ;;  %v126_v37 = vld [vmem:[#allocation3 + $0x18c] sm:$0xf] }
 0x100   :  { %v813_v20 = vadd.f32 %v812_v33, %v811_v53  ;;  %v819_v62 = vrot.slane %v818_v51, 1  ;;  %v826_v41 = vrot.slane %v825_v35, 1  ;;  %v830_v49 = vadd.f32 %v829_v11, %v828_v5 }
 0x101   :  { %3286 = vst [vmem:[#allocation67_spill] sm:$0xff] %v2645_v6  ;;  %v2650_v2 = vmul.f32 0.25, %v806_v46  ;;  %v1271_v54 = vmul.f32 %v2645_v6, %v2645_v6  ;;  %v1521_v27 = vsel %vm1438_vm2, %v1270_v22, %v1520_v34  ;;  %v835_v9 = vsel %vm155_vm0, %v124_v14, 0.0  ;;  %v128_v34 = vld [vmem:[#allocation3 + $0x194] sm:$0xf] }
 0x102   :  { %v820_v24 = vadd.f32 %v819_v62, %v818_v51  ;;  %v827_v7 = vadd.f32 %v826_v41, %v825_v35  ;;  %v2656_v31 = vmul.f32 0.25, %v813_v20  ;;  %v831_v12 = vrot.slane %v830_v49, 2  ;;  %v127_v35 = vld [vmem:[#allocation3 + $0x190] sm:$0xf] }
 0x103   :  { %3287 = vst [vmem:[#allocation68_spill] sm:$0xff] %v2650_v2  ;;  %v1272_v53 = vmul.f32 %v2650_v2, %v2650_v2  ;;  %v1522_v5 = vsel %vm1440_vm3, %v1271_v54, %v1521_v27  ;;  %v836_v26 = vrot.slane %v835_v9, 4  ;;  %v842_v33 = vsel %vm155_vm0, %v125_v32, 0.0 }
 0x104   :  { %3288 = vst [vmem:[#allocation69_spill] sm:$0xff] %v2656_v31  ;;  %v2662_v11 = vmul.f32 0.25, %v820_v24  ;;  %v2664_v46 = vmul.f32 0.25, %v827_v7  ;;  %v1273_v51 = vmul.f32 %v2656_v31, %v2656_v31  ;;  %v832_v14 = vadd.f32 %v831_v12, %v830_v49  ;;  %v129_v24 = vld [vmem:[#allocation3 + $0x198] sm:$0xf] }
 0x105   :  { %v1523_v22 = vsel %vm1442_vm4, %v1272_v53, %v1522_v5  ;;  %v837_v20 = vadd.f32 %v836_v26, %v835_v9  ;;  %v843_v62 = vrot.slane %v842_v33, 4  ;;  %v849_v41 = vsel %vm155_vm0, %v126_v37, 0.0  ;;  %v130_v31 = vld [vmem:[#allocation3 + $0x19c] sm:$0xf] }
 0x106   :  { %3289 = vst [vmem:[#allocation70_spill] sm:$0xff] %v2662_v11  ;;  %3290 = vst [vmem:[#allocation71_spill] sm:$0xff] %v2664_v46  ;;  %v1274_v54 = vmul.f32 %v2662_v11, %v2662_v11  ;;  %v1275_v32 = vmul.f32 %v2664_v46, %v2664_v46  ;;  %v1524_v27 = vsel %vm1444_vm5, %v1273_v51, %v1523_v22  ;;  %v833_v7 = vrot.slane %v832_v14, 1 }
 0x107   :  { %v838_v2 = vrot.slane %v837_v20, 2  ;;  %v844_v49 = vadd.f32 %v843_v62, %v842_v33  ;;  %v850_v12 = vrot.slane %v849_v41, 4  ;;  %v856_v53 = vsel %vm155_vm0, %v127_v35, 0.0 }
 0x108   :  { %v1525_v9 = vsel %vm1446_vm6, %v1274_v54, %v1524_v27  ;;  %v834_v5 = vadd.f32 %v833_v7, %v832_v14  ;;  %v857_v37 = vrot.slane %v856_v53, 4  ;;  %v863_v26 = vsel %vm155_vm0, %v128_v34, 0.0 }
 0x109   :  { %v1526_v11 = vsel %vm1448_vm7, %v1275_v32, %v1525_v9  ;;  %v839_v6 = vadd.f32 %v838_v2, %v837_v20  ;;  %v845_v46 = vrot.slane %v844_v49, 2  ;;  %v851_v55 = vadd.f32 %v850_v12, %v849_v41 }
 0x10a   :  { %1593 = vadd.xlane.f32.xlu1 %v1526_v11  ;;  %v858_v51 = vadd.f32 %v857_v37, %v856_v53  ;;  %v864_v22 = vrot.slane %v863_v26, 4  ;;  %v870_v48 = vsel %vm155_vm0, %v129_v24, 0.0  ;;  %v877_v33 = vsel %vm155_vm0, %v130_v31, 0.0  ;;  %v131_v11 = vld [vmem:[#allocation3 + $0x1a0] sm:$0xf] }
 0x10b   :  { %v840_v62 = vrot.slane %v839_v6, 1  ;;  %v846_v35 = vadd.f32 %v845_v46, %v844_v49  ;;  %v852_v36 = vrot.slane %v851_v55, 2  ;;  %v871_v54 = vrot.slane %v870_v48, 4 }
 0x10c   :  { %v859_v14 = vrot.slane %v858_v51, 2  ;;  %v865_v27 = vadd.f32 %v864_v22, %v863_v26  ;;  %v878_v7 = vrot.slane %v877_v33, 4  ;;  %v2681_v34 = vmul.f32 0.25, %v834_v5 }
 0x10d   :  { %v841_v32 = vadd.f32 %v840_v62, %v839_v6  ;;  %v847_v2 = vrot.slane %v846_v35, 1  ;;  %v853_v20 = vadd.f32 %v852_v36, %v851_v55  ;;  %v872_v41 = vadd.f32 %v871_v54, %v870_v48 }
 0x10e   :  { %3291 = vst [vmem:[#allocation72_spill] sm:$0xff] %v2681_v34  ;;  %v860_v12 = vadd.f32 %v859_v14, %v858_v51  ;;  %v866_v53 = vrot.slane %v865_v27, 2  ;;  %v879_v9 = vadd.f32 %v878_v7, %v877_v33  ;;  %v1276_v31 = vmul.f32 %v2681_v34, %v2681_v34 }
 0x10f   :  { %v848_v24 = vadd.f32 %v847_v2, %v846_v35  ;;  %v854_v46 = vrot.slane %v853_v20, 1  ;;  %v873_v49 = vrot.slane %v872_v41, 2  ;;  %v2685_v37 = vmul.f32 0.25, %v841_v32  ;;  %v132_v35 = vld [vmem:[#allocation3 + $0x1a4] sm:$0xf] }
 0x110   :  { %v861_v26 = vrot.slane %v860_v12, 1  ;;  %v867_v22 = vadd.f32 %v866_v53, %v865_v27  ;;  %v880_v5 = vrot.slane %v879_v9, 2  ;;  %v884_v6 = vsel %vm155_vm0, %v131_v11, 0.0  ;;  %v133_v53 = vld [vmem:[#allocation3 + $0x1a8] sm:$0xf] }
 0x111   :  { %3292 = vst [vmem:[#allocation73_spill] sm:$0xff] %v2685_v37  ;;  %v855_v62 = vadd.f32 %v854_v46, %v853_v20  ;;  %v874_v36 = vadd.f32 %v873_v49, %v872_v41  ;;  %v2688_v48 = vmul.f32 0.25, %v848_v24  ;;  %v1277_v55 = vmul.f32 %v2685_v37, %v2685_v37 }
 0x112   :  { %v862_v51 = vadd.f32 %v861_v26, %v860_v12  ;;  %v868_v33 = vrot.slane %v867_v22, 1  ;;  %v881_v54 = vadd.f32 %v880_v5, %v879_v9  ;;  %v885_v14 = vrot.slane %v884_v6, 4 }
 0x113   :  { %3293 = vst [vmem:[#allocation74_spill] sm:$0xff] %v2688_v48  ;;  %v875_v7 = vrot.slane %v874_v36, 1  ;;  %v2692_v32 = vmul.f32 0.25, %v855_v62  ;;  %v1278_v27 = vmul.f32 %v2688_v48, %v2688_v48  ;;  %v1527_v2 = vsel %vm1436_vm1, %v1277_v55, %v1276_v31 }
 0x114   :  { %v869_v20 = vadd.f32 %v868_v33, %v867_v22  ;;  %v882_v41 = vrot.slane %v881_v54, 1  ;;  %v2697_v11 = vmul.f32 0.25, %v862_v51  ;;  %v886_v24 = vadd.f32 %v885_v14, %v884_v6  ;;  %v134_v22 = vld [vmem:[#allocation3 + $0x1ac] sm:$0xf]  ;;  %v135_v14 = vld [vmem:[#allocation3 + $0x1b0] sm:$0xf] }
 0x115   :  { %3294 = vst [vmem:[#allocation75_spill] sm:$0xff] %v2692_v32  ;;  %v876_v46 = vadd.f32 %v875_v7, %v874_v36  ;;  %v1279_v12 = vmul.f32 %v2692_v32, %v2692_v32  ;;  %v1528_v9 = vsel %vm1438_vm2, %v1278_v27, %v1527_v2  ;;  %v891_v49 = vsel %vm155_vm0, %v132_v35, 0.0 }
 0x116   :  { %3295 = vst [vmem:[#allocation76_spill] sm:$0xff] %v2697_v11  ;;  %v883_v26 = vadd.f32 %v882_v41, %v881_v54  ;;  %v2703_v5 = vmul.f32 0.25, %v869_v20  ;;  %v1280_v31 = vmul.f32 %v2697_v11, %v2697_v11  ;;  %v887_v62 = vrot.slane %v886_v24, 2 }
 0x117   :  { %v2707_v55 = vmul.f32 0.25, %v876_v46  ;;  %v1529_v6 = vsel %vm1440_vm3, %v1279_v12, %v1528_v9  ;;  %v892_v36 = vrot.slane %v891_v49, 4  ;;  %v898_v51 = vsel %vm155_vm0, %v133_v53, 0.0  ;;  %v136_v12 = vld [vmem:[#allocation3 + $0x1b4] sm:$0xf] }
 0x118   :  { %3296 = vst [vmem:[#allocation77_spill] sm:$0xff] %v2703_v5  ;;  %v2711_v33 = vmul.f32 0.25, %v883_v26  ;;  %v1281_v35 = vmul.f32 %v2703_v5, %v2703_v5  ;;  %v1530_v54 = vsel %vm1442_vm4, %v1280_v31, %v1529_v6  ;;  %v888_v7 = vadd.f32 %v887_v62, %v886_v24  ;;  %v137_v9 = vld [vmem:[#allocation3 + $0x1b8] sm:$0xf] }
 0x119   :  { %3297 = vst [vmem:[#allocation78_spill] sm:$0xff] %v2707_v55  ;;  %v1282_v27 = vmul.f32 %v2707_v55, %v2707_v55  ;;  %v893_v2 = vadd.f32 %v892_v36, %v891_v49  ;;  %v899_v20 = vrot.slane %v898_v51, 4  ;;  %v905_v41 = vsel %vm155_vm0, %v134_v22, 0.0  ;;  %v138_v36 = vld [vmem:[#allocation3 + $0x1bc] sm:$0xf] }
 0x11a   :  { %3298 = vst [vmem:[#allocation79_spill] sm:$0xff] %v2711_v33  ;;  %v1283_v46 = vmul.f32 %v2711_v33, %v2711_v33  ;;  %v1531_v53 = vsel %vm1444_vm5, %v1281_v35, %v1530_v54  ;;  %v889_v26 = vrot.slane %v888_v7, 1  ;;  %v906_v5 = vrot.slane %v905_v41, 4 }
 0x11b   :  { %v1532_v31 = vsel %vm1446_vm6, %v1282_v27, %v1531_v53  ;;  %v894_v6 = vrot.slane %v893_v2, 2  ;;  %v900_v24 = vadd.f32 %v899_v20, %v898_v51  ;;  %v912_v62 = vsel %vm155_vm0, %v135_v14, 0.0 }
 0x11c   :  { %v1533_v49 = vsel %vm1448_vm7, %v1283_v46, %v1532_v31  ;;  %v890_v55 = vadd.f32 %v889_v26, %v888_v7  ;;  %v907_v22 = vadd.f32 %v906_v5, %v905_v41  ;;  %v913_v11 = vrot.slane %v912_v62, 4 }
 0x11d   :  { %1595 = vadd.xlane.f32.xlu0 %v1533_v49  ;;  %v895_v33 = vadd.f32 %v894_v6, %v893_v2  ;;  %v901_v32 = vrot.slane %v900_v24, 2  ;;  %v919_v35 = vsel %vm155_vm0, %v136_v12, 0.0  ;;  %v926_v54 = vsel %vm155_vm0, %v137_v9, 0.0  ;;  %v139_v2 = vld [vmem:[#allocation3 + $0x1c0] sm:$0xf] }
 0x11e   :  { %v908_v48 = vrot.slane %v907_v22, 2  ;;  %v914_v37 = vadd.f32 %v913_v11, %v912_v62  ;;  %v920_v27 = vrot.slane %v919_v35, 4  ;;  %v927_v53 = vrot.slane %v926_v54, 4 }
 0x11f   :  { %v896_v51 = vrot.slane %v895_v33, 1  ;;  %v902_v20 = vadd.f32 %v901_v32, %v900_v24  ;;  %v933_v14 = vsel %vm155_vm0, %v138_v36, 0.0  ;;  %v2728_v46 = vmul.f32 0.25, %v890_v55 }
 0x120   :  { %v909_v7 = vadd.f32 %v908_v48, %v907_v22  ;;  %v915_v5 = vrot.slane %v914_v37, 2  ;;  %v921_v41 = vadd.f32 %v920_v27, %v919_v35  ;;  %v928_v26 = vadd.f32 %v927_v53, %v926_v54 }
 0x121   :  { %3299 = vst [vmem:[#allocation80_spill] sm:$0xff] %v2728_v46  ;;  %v897_v31 = vadd.f32 %v896_v51, %v895_v33  ;;  %v903_v6 = vrot.slane %v902_v20, 1  ;;  %v934_v12 = vrot.slane %v933_v14, 4  ;;  %v1284_v9 = vmul.f32 %v2728_v46, %v2728_v46 }
 0x122   :  { %v910_v11 = vrot.slane %v909_v7, 1  ;;  %v916_v62 = vadd.f32 %v915_v5, %v914_v37  ;;  %v922_v49 = vrot.slane %v921_v41, 2  ;;  %v929_v34 = vrot.slane %v928_v26, 2 }
 0x123   :  { %v904_v32 = vadd.f32 %v903_v6, %v902_v20  ;;  %v935_v24 = vadd.f32 %v934_v12, %v933_v14  ;;  %v2732_v36 = vmul.f32 0.25, %v897_v31  ;;  %v940_v48 = vsel %vm155_vm0, %v139_v2, 0.0  ;;  %v140_v14 = vld [vmem:[#allocation3 + $0x1c4] sm:$0xf] }
 0x124   :  { %v911_v55 = vadd.f32 %v910_v11, %v909_v7  ;;  %v917_v22 = vrot.slane %v916_v62, 1  ;;  %v923_v35 = vadd.f32 %v922_v49, %v921_v41  ;;  %v930_v54 = vadd.f32 %v929_v34, %v928_v26  ;;  %v141_v11 = vld [vmem:[#allocation3 + $0x1c8] sm:$0xf] }
 0x125   :  { %3300 = vst [vmem:[#allocation81_spill] sm:$0xff] %v2732_v36  ;;  %v936_v33 = vrot.slane %v935_v24, 2  ;;  %v2735_v27 = vmul.f32 0.25, %v904_v32  ;;  %v1285_v53 = vmul.f32 %v2732_v36, %v2732_v36  ;;  %v941_v51 = vrot.slane %v940_v48, 4 }
 0x126   :  { %v918_v37 = vadd.f32 %v917_v22, %v916_v62  ;;  %v924_v5 = vrot.slane %v923_v35, 1  ;;  %v931_v46 = vrot.slane %v930_v54, 1  ;;  %v2739_v20 = vmul.f32 0.25, %v911_v55 }
 0x127   :  { %3301 = vst [vmem:[#allocation82_spill] sm:$0xff] %v2735_v27  ;;  %v937_v31 = vadd.f32 %v936_v33, %v935_v24  ;;  %v1286_v7 = vmul.f32 %v2735_v27, %v2735_v27  ;;  %v1534_v41 = vsel %vm1436_vm1, %v1285_v53, %v1284_v9  ;;  %v942_v34 = vadd.f32 %v941_v51, %v940_v48  ;;  %v142_v48 = vld [vmem:[#allocation3 + $0x1cc] sm:$0xf] }
 0x128   :  { %3302 = vst [vmem:[#allocation83_spill] sm:$0xff] %v2739_v20  ;;  %v925_v26 = vadd.f32 %v924_v5, %v923_v35  ;;  %v932_v2 = vadd.f32 %v931_v46, %v930_v54  ;;  %v2744_v6 = vmul.f32 0.25, %v918_v37  ;;  %v1287_v12 = vmul.f32 %v2739_v20, %v2739_v20  ;;  %v143_v54 = vld [vmem:[#allocation3 + $0x1d0] sm:$0xf] }
 0x129   :  { %v938_v62 = vrot.slane %v937_v31, 1  ;;  %v1535_v49 = vsel %vm1438_vm2, %v1286_v7, %v1534_v41  ;;  %v943_v32 = vrot.slane %v942_v34, 2  ;;  %v947_v24 = vsel %vm155_vm0, %v140_v14, 0.0 }
 0x12a   :  { %3303 = vst [vmem:[#allocation84_spill] sm:$0xff] %v2744_v6  ;;  %v2750_v55 = vmul.f32 0.25, %v925_v26  ;;  %v2752_v22 = vmul.f32 0.25, %v932_v2  ;;  %v1288_v9 = vmul.f32 %v2744_v6, %v2744_v6  ;;  %v1536_v46 = vsel %vm1440_vm3, %v1287_v12, %v1535_v49  ;;  %v144_v26 = vld [vmem:[#allocation3 + $0x1d4] sm:$0xf] }
 0x12b   :  { %v939_v35 = vadd.f32 %v938_v62, %v937_v31  ;;  %v944_v33 = vadd.f32 %v943_v32, %v942_v34  ;;  %v948_v53 = vrot.slane %v947_v24, 4  ;;  %v954_v51 = vsel %vm155_vm0, %v141_v11, 0.0  ;;  %v145_v62 = vld [vmem:[#allocation3 + $0x1d8] sm:$0xf] }
 0x12c   :  { %3304 = vst [vmem:[#allocation85_spill] sm:$0xff] %v2750_v55  ;;  %3305 = vst [vmem:[#allocation86_spill] sm:$0xff] %v2752_v22  ;;  %v1289_v37 = vmul.f32 %v2750_v55, %v2750_v55  ;;  %v1290_v5 = vmul.f32 %v2752_v22, %v2752_v22  ;;  %v1537_v14 = vsel %vm1442_vm4, %v1288_v9, %v1536_v46  ;;  %v955_v7 = vrot.slane %v954_v51, 4  ;;  %v146_v55 = vld [vmem:[#allocation3 + $0x1dc] sm:$0xf] }
 0x12d   :  { %v2763_v41 = vmul.f32 0.25, %v939_v35  ;;  %v945_v2 = vrot.slane %v944_v33, 1  ;;  %v949_v12 = vadd.f32 %v948_v53, %v947_v24  ;;  %v961_v31 = vsel %vm155_vm0, %v142_v48, 0.0 }
 0x12e   :  { %v1538_v34 = vsel %vm1444_vm5, %v1289_v37, %v1537_v14  ;;  %v956_v11 = vadd.f32 %v955_v7, %v954_v51  ;;  %v962_v49 = vrot.slane %v961_v31, 4  ;;  %v968_v32 = vsel %vm155_vm0, %v143_v54, 0.0 }
 0x12f   :  { %3306 = vst [vmem:[#allocation87_spill] sm:$0xff] %v2763_v41  ;;  %v1291_v22 = vmul.f32 %v2763_v41, %v2763_v41  ;;  %v1539_v9 = vsel %vm1446_vm6, %v1290_v5, %v1538_v34  ;;  %v946_v46 = vadd.f32 %v945_v2, %v944_v33  ;;  %v950_v35 = vrot.slane %v949_v12, 2 }
 0x130   :  { %v957_v6 = vrot.slane %v956_v11, 2  ;;  %v963_v20 = vadd.f32 %v962_v49, %v961_v31  ;;  %v969_v24 = vrot.slane %v968_v32, 4  ;;  %v975_v48 = vsel %vm155_vm0, %v144_v26, 0.0 }
 0x131   :  { %v1540_v53 = vsel %vm1448_vm7, %v1291_v22, %v1539_v9  ;;  %v951_v37 = vadd.f32 %v950_v35, %v949_v12  ;;  %v976_v51 = vrot.slane %v975_v48, 4  ;;  %v982_v14 = vsel %vm155_vm0, %v145_v62, 0.0  ;;  %v147_v22 = vld [vmem:[#allocation3 + $0x1e0] sm:$0xf] }
 0x132   :  { %1597 = vadd.xlane.f32.xlu1 %v1540_v53  ;;  %v958_v54 = vadd.f32 %v957_v6, %v956_v11  ;;  %v964_v7 = vrot.slane %v963_v20, 2  ;;  %v970_v41 = vadd.f32 %v969_v24, %v968_v32  ;;  %v983_v27 = vrot.slane %v982_v14, 4 }
 0x133   :  { %v952_v5 = vrot.slane %v951_v37, 1  ;;  %v977_v33 = vadd.f32 %v976_v51, %v975_v48  ;;  %v989_v2 = vsel %vm155_vm0, %v146_v55, 0.0  ;;  %v2775_v34 = vmul.f32 0.25, %v946_v46 }
 0x134   :  { %v959_v31 = vrot.slane %v958_v54, 1  ;;  %v965_v49 = vadd.f32 %v964_v7, %v963_v20  ;;  %v971_v26 = vrot.slane %v970_v41, 2  ;;  %v984_v36 = vadd.f32 %v983_v27, %v982_v14 }
 0x135   :  { %v953_v12 = vadd.f32 %v952_v5, %v951_v37  ;;  %v978_v9 = vrot.slane %v977_v33, 2  ;;  %v990_v35 = vrot.slane %v989_v2, 4  ;;  %v1292_v6 = vmul.f32 %v2775_v34, %v2775_v34 }
 0x136   :  { %v960_v62 = vadd.f32 %v959_v31, %v958_v54  ;;  %v966_v11 = vrot.slane %v965_v49, 1  ;;  %v972_v32 = vadd.f32 %v971_v26, %v970_v41  ;;  %v985_v24 = vrot.slane %v984_v36, 2 }
 0x137   :  { %v979_v48 = vadd.f32 %v978_v9, %v977_v33  ;;  %v991_v53 = vadd.f32 %v990_v35, %v989_v2  ;;  %v2779_v55 = vmul.f32 0.25, %v953_v12  ;;  %v996_v46 = vsel %vm155_vm0, %v147_v22, 0.0  ;;  %v148_v2 = vld [vmem:[#allocation3 + $0x1e4] sm:$0xf] }
 0x138   :  { %v967_v20 = vadd.f32 %v966_v11, %v965_v49  ;;  %v973_v51 = vrot.slane %v972_v32, 1  ;;  %v986_v27 = vadd.f32 %v985_v24, %v984_v36  ;;  %v2782_v14 = vmul.f32 0.25, %v960_v62 }
 0x139   :  { %v980_v37 = vrot.slane %v979_v48, 1  ;;  %v992_v7 = vrot.slane %v991_v53, 2  ;;  %v1293_v5 = vmul.f32 %v2779_v55, %v2779_v55  ;;  %v997_v54 = vrot.slane %v996_v46, 4 }
 0x13a   :  { %3307 = vst [vmem:[#allocation88_spill] sm:$0xff] %v2782_v14  ;;  %v974_v31 = vadd.f32 %v973_v51, %v972_v32  ;;  %v987_v41 = vrot.slane %v986_v27, 1  ;;  %v2786_v26 = vmul.f32 0.25, %v967_v20  ;;  %v1294_v33 = vmul.f32 %v2782_v14, %v2782_v14  ;;  %v149_v32 = vld [vmem:[#allocation3 + $0x1e8] sm:$0xf] }
 0x13b   :  { %v981_v22 = vadd.f32 %v980_v37, %v979_v48  ;;  %v993_v49 = vadd.f32 %v992_v7, %v991_v53  ;;  %v1541_v36 = vsel %vm1436_vm1, %v1293_v5, %v1292_v6  ;;  %v998_v12 = vadd.f32 %v997_v54, %v996_v46  ;;  %v150_v46 = vld [vmem:[#allocation3 + $0x1ec] sm:$0xf] }
 0x13c   :  { %3308 = vst [vmem:[#allocation89_spill] sm:$0xff] %v2786_v26  ;;  %v988_v9 = vadd.f32 %v987_v41, %v986_v27  ;;  %v2791_v35 = vmul.f32 0.25, %v974_v31  ;;  %v1295_v62 = vmul.f32 %v2786_v26, %v2786_v26  ;;  %v1542_v11 = vsel %vm1438_vm2, %v1294_v33, %v1541_v36  ;;  %v151_v33 = vld [vmem:[#allocation3 + $0x1f0] sm:$0xf] }
 0x13d   :  { %v994_v24 = vrot.slane %v993_v49, 1  ;;  %v2796_v20 = vmul.f32 0.25, %v981_v22  ;;  %v999_v51 = vrot.slane %v998_v12, 2  ;;  %v1003_v13 = vsel %vm155_vm0, %v148_v2, 0.0  ;;  %v152_v2 = vld [vmem:[#allocation3 + $0x1f4] sm:$0xf] }
 0x13e   :  { %3309 = vst [vmem:[#allocation90_spill] sm:$0xff] %v2791_v35  ;;  %v2799_v48 = vmul.f32 0.25, %v988_v9  ;;  %v1296_v6 = vmul.f32 %v2791_v35, %v2791_v35  ;;  %v1543_v53 = vsel %vm1440_vm3, %v1295_v62, %v1542_v11  ;;  %v1004_v27 = vrot.slane %v1003_v13, 4 }
 0x13f   :  { %3310 = vst [vmem:[#allocation91_spill] sm:$0xff] %v2796_v20  ;;  %v995_v37 = vadd.f32 %v994_v24, %v993_v49  ;;  %v1297_v7 = vmul.f32 %v2796_v20, %v2796_v20  ;;  %v1000_v5 = vadd.f32 %v999_v51, %v998_v12  ;;  %v1010_v54 = vsel %vm155_vm0, %v149_v32, 0.0  ;;  %v153_v24 = vld [vmem:[#allocation3 + $0x1f8] sm:$0xf]  ;;  %v154_v32 = vld [vmem:[#allocation3 + $0x1fc] sm:$0xf] }
 0x140   :  { %3311 = vst [vmem:[#allocation92_spill] sm:$0xff] %v2799_v48  ;;  %v1298_v31 = vmul.f32 %v2799_v48, %v2799_v48  ;;  %v1544_v41 = vsel %vm1442_vm4, %v1296_v6, %v1543_v53  ;;  %v1005_v22 = vadd.f32 %v1004_v27, %v1003_v13  ;;  %v1011_v36 = vrot.slane %v1010_v54, 4 }
 0x141   :  { %v2810_v9 = vmul.f32 0.25, %v995_v37  ;;  %v1545_v62 = vsel %vm1444_vm5, %v1297_v7, %v1544_v41  ;;  %v1001_v49 = vrot.slane %v1000_v5, 1  ;;  %v1017_v11 = vsel %vm155_vm0, %v150_v46, 0.0 }
 0x142   :  { %v1546_v12 = vsel %vm1446_vm6, %v1298_v31, %v1545_v62  ;;  %v1006_v51 = vrot.slane %v1005_v22, 2  ;;  %v1012_v20 = vadd.f32 %v1011_v36, %v1010_v54  ;;  %v1018_v48 = vrot.slane %v1017_v11, 4 }
 0x143   :  { %3312 = vst [vmem:[#allocation93_spill] sm:$0xff] %v2810_v9  ;;  %v1299_v6 = vmul.f32 %v2810_v9, %v2810_v9  ;;  %v1002_v53 = vadd.f32 %v1001_v49, %v1000_v5  ;;  %v1024_v13 = vsel %vm155_vm0, %v151_v33, 0.0  ;;  %v1031_v27 = vsel %vm155_vm0, %v152_v2, 0.0 }
 0x144   :  { %v1007_v37 = vadd.f32 %v1006_v51, %v1005_v22  ;;  %v1013_v7 = vrot.slane %v1012_v20, 2  ;;  %v1019_v41 = vadd.f32 %v1018_v48, %v1017_v11  ;;  %v1025_v35 = vrot.slane %v1024_v13, 4 }
 0x145   :  { %v1547_v46 = vsel %vm1448_vm7, %v1299_v6, %v1546_v12  ;;  %v1032_v31 = vrot.slane %v1031_v27, 4  ;;  %v1038_v62 = vsel %vm155_vm0, %v153_v24, 0.0  ;;  %v1045_v54 = vsel %vm155_vm0, %v154_v32, 0.0 }
 0x146   :  { %1599 = vadd.xlane.f32.xlu0 %v1547_v46  ;;  %v1008_v36 = vrot.slane %v1007_v37, 1  ;;  %v1014_v26 = vadd.f32 %v1013_v7, %v1012_v20  ;;  %v1020_v9 = vrot.slane %v1019_v41, 2  ;;  %v1026_v5 = vadd.f32 %v1025_v35, %v1024_v13 }
 0x147   :  { %v1033_v49 = vadd.f32 %v1032_v31, %v1031_v27  ;;  %v1039_v33 = vrot.slane %v1038_v62, 4  ;;  %v1046_v50 = vrot.slane %v1045_v54, 4  ;;  %v2822_v2 = vmul.f32 0.25, %v1002_v53 }
 0x148   :  { %v1009_v22 = vadd.f32 %v1008_v36, %v1007_v37  ;;  %v1015_v48 = vrot.slane %v1014_v26, 1  ;;  %v1021_v11 = vadd.f32 %v1020_v9, %v1019_v41  ;;  %v1027_v51 = vrot.slane %v1026_v5, 2 }
 0x149   :  { %v1034_v12 = vrot.slane %v1033_v49, 2  ;;  %v1040_v6 = vadd.f32 %v1039_v33, %v1038_v62  ;;  %v1047_v14 = vadd.f32 %v1046_v50, %v1045_v54  ;;  %v1300_v24 = vmul.f32 %v2822_v2, %v2822_v2 }
 0x14a   :  { %v1016_v32 = vadd.f32 %v1015_v48, %v1014_v26  ;;  %v1022_v46 = vrot.slane %v1021_v11, 1  ;;  %v1028_v20 = vadd.f32 %v1027_v51, %v1026_v5  ;;  %v2826_v7 = vmul.f32 0.25, %v1009_v22 }
 0x14b   :  { %v1035_v35 = vadd.f32 %v1034_v12, %v1033_v49  ;;  %v1041_v13 = vrot.slane %v1040_v6, 2  ;;  %v1048_v27 = vrot.slane %v1047_v14, 2 }
 0x14c   :  { %v1023_v53 = vadd.f32 %v1022_v46, %v1021_v11  ;;  %v1029_v31 = vrot.slane %v1028_v20, 1  ;;  %v2828_v37 = vmul.f32 0.25, %v1016_v32  ;;  %v1301_v9 = vmul.f32 %v2826_v7, %v2826_v7 }
 0x14d   :  { %v1036_v41 = vrot.slane %v1035_v35, 1  ;;  %v1042_v50 = vadd.f32 %v1041_v13, %v1040_v6  ;;  %v1049_v62 = vadd.f32 %v1048_v27, %v1047_v14 }
 0x14e   :  { %v1030_v54 = vadd.f32 %v1029_v31, %v1028_v20  ;;  %v2832_v36 = vmul.f32 0.25, %v1023_v53  ;;  %v1302_v26 = vmul.f32 %v2828_v37, %v2828_v37  ;;  %v1548_v5 = vsel %vm1436_vm1, %v1301_v9, %v1300_v24  ;;  %v1572_v9 = vpop.xlane.xlu0 %1571 }
 0x14f   :  { %v1037_v49 = vadd.f32 %v1036_v41, %v1035_v35  ;;  %v1043_v33 = vrot.slane %v1042_v50, 1  ;;  %v1050_v22 = vrot.slane %v1049_v62, 1 }
 0x150   :  { %v2837_v48 = vmul.f32 0.25, %v1030_v54  ;;  %v1303_v11 = vmul.f32 %v2832_v36, %v2832_v36  ;;  %v1549_v51 = vsel %vm1438_vm2, %v1302_v26, %v1548_v5  ;;  %v1781_v54 = vsel %vm1436_vm1, %v2119_v61, %v2117_v60  ;;  %v1576_v5 = vpop.xlane.xlu1 %1575 }
 0x151   :  { %v1044_v12 = vadd.f32 %v1043_v33, %v1042_v50  ;;  %v1051_v14 = vadd.f32 %v1050_v22, %v1049_v62  ;;  %v2842_v6 = vmul.f32 0.25, %v1037_v49  ;;  %v1603_v62 = vmax.f32 %v1572_v9, 1e-24 }
 0x152   :  { %v1304_v32 = vmul.f32 %v2837_v48, %v2837_v48  ;;  %v1550_v46 = vsel %vm1440_vm3, %v1303_v11, %v1549_v51  ;;  %v1574_v26 = vpop.xlane.xlu0 %1573  ;;  %v1782_v49 = vsel %vm1438_vm2, %v2121_v0, %v1781_v54  ;;  %v1788_v22 = vsel %vm1436_vm1, %v2168_v28, %v2164_v15 }
 0x153   :  { %v2847_v24 = vmul.f32 0.25, %v1044_v12  ;;  %v2849_v20 = vmul.f32 0.25, %v1051_v14  ;;  %v1305_v35 = vmul.f32 %v2842_v6, %v2842_v6  ;;  %1996 = vrsqrt.f32 %v1603_v62 }
 0x154   :  { %v1551_v13 = vsel %vm1442_vm4, %v1304_v32, %v1550_v46  ;;  %v1604_v33 = vmax.f32 %v1574_v26, 1e-24  ;;  %v1605_v11 = vmax.f32 %v1576_v5, 1e-24  ;;  %v1795_v51 = vsel %vm1436_vm1, %v2213_v63, %v2211_v52  ;;  %v1578_v0 = vpop.xlane.xlu1 %1577  ;;  %v3313_v26 = vld [vmem:[#allocation13_spill] sm:$0xff] }
 0x155   :  { %v1306_v27 = vmul.f32 %v2847_v24, %v2847_v24  ;;  %v1307_v53 = vmul.f32 %v2849_v20, %v2849_v20  ;;  %v1552_v31 = vsel %vm1444_vm5, %v1305_v35, %v1551_v13  ;;  %v1783_v12 = vsel %vm1440_vm3, %v2123_v1, %v1782_v49  ;;  %v3314_v5 = vld [vmem:[#allocation9_spill] sm:$0xff] }
 0x156   :  { %v1789_v60 = vsel %vm1438_vm2, %v2170_v29, %v1788_v22  ;;  %1998 = vrsqrt.f32 %v1604_v33  ;;  %v1796_v61 = vsel %vm1438_vm2, %v2217_v8, %v1795_v51  ;;  %v1784_v15 = vsel %vm1442_vm4, %v2125_v3, %v1783_v12  ;;  %v1580_v8 = vpop.xlane.xlu0 %1579  ;;  %v3316_v33 = vld [vmem:[#allocation10_spill] sm:$0xff]  ;;  %v3317_v22 = vld [vmem:[#allocation24_spill] sm:$0xff] }
 0x157   :  { %v1553_v41 = vsel %vm1446_vm6, %v1306_v27, %v1552_v31  ;;  %2000 = vrsqrt.f32 %v1605_v11  ;;  %v1790_v28 = vsel %vm1440_vm3, %v2172_v30, %v1789_v60  ;;  %v1797_v52 = vsel %vm1440_vm3, %v2219_v10, %v1796_v61  ;;  %v3318_v11 = vld [vmem:[#allocation25_spill] sm:$0xff]  ;;  %v3319_v60 = vld [vmem:[#allocation14_spill] sm:$0xff] }
 0x158   :  { %v1554_v50 = vsel %vm1448_vm7, %v1307_v53, %v1553_v41  ;;  %v1606_v63 = vmax.f32 %v1578_v0, 1e-24  ;;  %v1785_v1 = vsel %vm1444_vm5, %v2127_v4, %v1784_v15  ;;  %v1802_v29 = vsel %vm1436_vm1, %v2260_v57, %v2258_v47  ;;  %v1582_v30 = vpop.xlane.xlu1 %1581 }
 0x159   :  { %1601 = vadd.xlane.f32.xlu1 %v1554_v50  ;;  %v1791_v14 = vsel %vm1442_vm4, %v2181_v42, %v1790_v28  ;;  %v2894_v3 = vstv %s3140_s0  ;;  %v1798_v10 = vsel %vm1442_vm4, %v2226_v21, %v1797_v52  ;;  %v1786_v4 = vsel %vm1446_vm6, %v2143_v18, %v1785_v1  ;;  %v3320_v28 = vld [vmem:[#allocation19_spill] sm:$0xff]  ;;  %s2079_s0 = smov [#allocation6]  }
 0x15a   :  { %v1803_v47 = vsel %vm1438_vm2, %v2267_v16, %v1802_v29  ;;  %2002 = vrsqrt.f32 %v1606_v63  ;;  %v1607_v57 = vmax.f32 %v1580_v8, 1e-24  ;;  %v1792_v42 = vsel %vm1444_vm5, %v2183_v43, %v1791_v14  ;;  %v1584_v13 = vpop.xlane.xlu0 %1583  ;;  %v3321_v29 = vld [vmem:[#allocation11_spill] sm:$0xff]  ;;  %v3322_v14 = vld [vmem:[#allocation26_spill] sm:$0xff]  ;;  %s1978_s24 = sshll.u32 %s2079_s0, 4  ;;  %s1979_s24 = int_to_ptr.vmem [resolvable:$true] %s1978_s24 }
 0x15b   :  { %v1809_v46 = vsel %vm1436_vm1, %v2309_v25, %v2305_v58  ;;  %v1799_v21 = vsel %vm1444_vm5, %v2236_v39, %v1798_v10  ;;  %v1787_v18 = vsel %vm1448_vm7, %v2145_v19, %v1786_v4  ;;  %v1804_v53 = vsel %vm1440_vm3, %v2269_v17, %v1803_v47  ;;  %v3324_v47 = vld [vmem:[#allocation15_spill] sm:$0xff]  ;;  %s2050_s25 = scalar_lea.vmem %s1979_s24, 2048  ;;  %p2055_p9 = scmp.lt.s32.totalorder %s1979_s24, %s1979_s24 }
 0x15c   :  { %v1586_v16 = vpop.xlane.xlu1 %1585  ;;  %v1608_v43 = vmax.f32 %v1582_v30, 1e-24  ;;  %v1793_v9 = vsel %vm1446_vm6, %v2185_v45, %v1792_v42  ;;  %v1810_v58 = vsel %vm1438_vm2, %v2314_v44, %v1809_v46  ;;  %2004 = vrsqrt.f32 %v1607_v57  ;;  %v3323_v30 = vld [vmem:[#allocation88_spill] sm:$0xff]  ;;  %p2051_p8 = scmp.ne.s32.totalorder %s1979_s24, %s2050_s25  ;;  %p2056_p10 = scmp.lt.s32.totalorder %s2050_s25, %s2050_s25 }
 0x15d   :  { %v1997_v32 = vpop.eup %1996  ;;  %v1609_v25 = vmax.f32 %v1584_v13, 1e-24  ;;  %v1800_v39 = vsel %vm1446_vm6, %v2238_v40, %v1799_v21  ;;  %v1816_v19 = vsel %vm1436_vm1, %v2354_v38, %v2352_v56  ;;  %v1610_v50 = vmax.f32 %v1586_v16, 1e-24  ;;  %v3315_v38 = vld [vmem:[#allocation18_spill] sm:$0xff]  ;;  %v3328_v13 = vld [vmem:[#allocation20_spill] sm:$0xff] }
 0x15e   :  { %v1637_v35 = vmul.f32 %v1997_v32, %v2894_v3  ;;  %v1805_v62 = vsel %vm1442_vm4, %v2271_v23, %v1804_v53  ;;  %v1794_v45 = vsel %vm1448_vm7, %v2198_v59, %v1793_v9  ;;  %v1588_v54 = vpop.xlane.xlu0 %1587  ;;  %v1811_v40 = vsel %vm1440_vm3, %v3313_v26, %v1810_v58  ;;  %v3330_v53 = vld [vmem:[#allocation12_spill] sm:$0xff]  ;;  %v3338_v26 = vld [vmem:[#allocation41_spill] sm:$0xff]  ;;  %p2057_p11 = por %p2056_p10, %p2055_p9 }
 0x15f   :  { %2006 = vrsqrt.f32 %v1608_v43  ;;  %v1801_v56 = vsel %vm1448_vm7, %v3314_v5, %v1800_v39  ;;  %v1817_v49 = vsel %vm1438_vm2, %v3315_v38, %v1816_v19  ;;  %v1806_v23 = vsel %vm1444_vm5, %v3316_v33, %v1805_v62  ;;  %v3331_v43 = vld [vmem:[#allocation27_spill] sm:$0xff]  ;;  %v3333_v39 = vld [vmem:[#allocation16_spill] sm:$0xff] }
 0x160   :  { %v1999_v27 = vpop.eup %1998  ;;  %v1909_v41 = vmul.f32 %v1787_v18, %v1637_v35  ;;  %2008 = vrsqrt.f32 %v1609_v25  ;;  %v1823_v59 = vsel %vm1436_vm1, %v3318_v11, %v3317_v22  ;;  %v1611_v12 = vmax.f32 %v1588_v54, 1e-24  ;;  %v3337_v54 = vld [vmem:[#allocation40_spill] sm:$0xff]  ;;  %p2058_p12 = pnand %p2057_p11, %p2051_p8 }
 0x161   :  { %v2001_v31 = vpop.eup %2000  ;;  %v1638_v17 = vmul.f32 %v1999_v27, %v2894_v3  ;;  %2010 = vrsqrt.f32 %v1610_v50  ;;  %v1812_v61 = vsel %vm1442_vm4, %v3319_v60, %v1811_v40  ;;  %v1818_v52 = vsel %vm1440_vm3, %v3320_v28, %v1817_v49  ;;  %v3342_v60 = vld [vmem:[#allocation35_spill] sm:$0xff]  ;;  %v3343_v28 = vld [vmem:[#allocation22_spill] sm:$0xff] }
 0x162   :  { %v1639_v44 = vmul.f32 %v2001_v31, %v2894_v3  ;;  %v1879_v63 = vsel %vm1436_vm1, %v2779_v55, %v2775_v34  ;;  %v1886_v1 = vsel %vm1436_vm1, %v2826_v7, %v2822_v2  ;;  %v1807_v8 = vsel %vm1446_vm6, %v3321_v29, %v1806_v23  ;;  %v3325_v34 = vld [vmem:[#allocation32_spill] sm:$0xff]  ;;  %v3326_v55 = vld [vmem:[#allocation33_spill] sm:$0xff] }
 0x163   :  { %v1910_v51 = vmul.f32 %v1794_v45, %v1638_v17  ;;  %v1824_v32 = vsel %vm1438_vm2, %v3322_v14, %v1823_v59  ;;  %v1880_v10 = vsel %vm1438_vm2, %v3323_v30, %v1879_v63  ;;  %v1887_v4 = vsel %vm1438_vm2, %v2828_v37, %v1886_v1  ;;  %v3327_v2 = vld [vmem:[#allocation89_spill] sm:$0xff]  ;;  %v3329_v37 = vld [vmem:[#allocation90_spill] sm:$0xff]  ;;  %v3340_v23 = vld [vmem:[#allocation28_spill] sm:$0xff] }
 0x164   :  { %v2003_v0 = vpop.eup %2002  ;;  %v1911_v15 = vmul.f32 %v1801_v56, %v1639_v44  ;;  %v1813_v57 = vsel %vm1444_vm5, %v3324_v47, %v1812_v61  ;;  %v1830_v42 = vsel %vm1436_vm1, %v3326_v55, %v3325_v34  ;;  %v1881_v7 = vsel %vm1440_vm3, %v3327_v2, %v1880_v10  ;;  %v3336_v45 = vld [vmem:[#allocation21_spill] sm:$0xff]  ;;  %v3350_v55 = vld [vmem:[#allocation43_spill] sm:$0xff] }
 0x165   :  { %v1888_v46 = vsel %vm1440_vm3, %v2832_v36, %v1887_v4  ;;  %v1640_v35 = vmul.f32 %v2003_v0, %v2894_v3  ;;  %v1819_v21 = vsel %vm1442_vm4, %v3328_v13, %v1818_v52  ;;  %v1882_v27 = vsel %vm1442_vm4, %v3329_v37, %v1881_v7  ;;  %v3332_v36 = vld [vmem:[#allocation91_spill] sm:$0xff]  ;;  %v3341_v59 = vld [vmem:[#allocation17_spill] sm:$0xff]  ;;  %v3344_v52 = vld [vmem:[#allocation42_spill] sm:$0xff] }
 0x166   :  { %v1889_v18 = vsel %vm1442_vm4, %v2837_v48, %v1888_v46  ;;  %v2005_v16 = vpop.eup %2004  ;;  %v1808_v31 = vsel %vm1448_vm7, %v3330_v53, %v1807_v8  ;;  %v1825_v9 = vsel %vm1440_vm3, %v3331_v43, %v1824_v32  ;;  %v1883_v58 = vsel %vm1444_vm5, %v3332_v36, %v1882_v27  ;;  %v3335_v48 = vld [vmem:[#allocation92_spill] sm:$0xff]  ;;  %v3345_v1 = vld [vmem:[#allocation29_spill] sm:$0xff]  ;;  %v3352_v7 = vld [vmem:[#allocation50_spill] sm:$0xff] }
 0x167   :  { %v1890_v25 = vsel %vm1444_vm5, %v2842_v6, %v1889_v18  ;;  %v1814_v19 = vsel %vm1446_vm6, %v3333_v39, %v1813_v57  ;;  %v1884_v50 = vsel %vm1446_vm6, %v3335_v48, %v1883_v58  ;;  %v1820_v44 = vsel %vm1444_vm5, %v3336_v45, %v1819_v21  ;;  %v3339_v6 = vld [vmem:[#allocation93_spill] sm:$0xff]  ;;  %v3346_v8 = vld [vmem:[#allocation48_spill] sm:$0xff]  ;;  %v3349_v57 = vld [vmem:[#allocation23_spill] sm:$0xff] }
 0x168   :  { %v1891_v62 = vsel %vm1446_vm6, %v2847_v24, %v1890_v25  ;;  %v1837_v40 = vsel %vm1436_vm1, %v3338_v26, %v3337_v54  ;;  %v2997_v5 = vsel %vm1448_vm7, %v3339_v6, %v1884_v50  ;;  %v1912_v49 = vmul.f32 %v1808_v31, %v1640_v35  ;;  %v3347_v14 = vld [vmem:[#allocation49_spill] sm:$0xff]  ;;  %v3348_v4 = vld [vmem:[#allocation36_spill] sm:$0xff]  ;;  %v3358_v58 = vld [vmem:[#allocation51_spill] sm:$0xff] }
 0x169   :  { %v3001_v56 = vsel %vm1448_vm7, %v2849_v20, %v1891_v62  ;;  %v2007_v38 = vpop.eup %2006  ;;  %v1641_v24 = vmul.f32 %v2005_v16, %v2894_v3  ;;  %v1826_v22 = vsel %vm1442_vm4, %v3340_v23, %v1825_v9  ;;  %v1821_v20 = vsel %vm1446_vm6, %v3343_v28, %v1820_v44  ;;  %v3353_v35 = vld [vmem:[#allocation37_spill] sm:$0xff]  ;;  %v3354_v21 = vld [vmem:[#allocation56_spill] sm:$0xff]  ;;  %v3357_v9 = vld [vmem:[#allocation31_spill] sm:$0xff] }
 0x16a   :  { %v2009_v11 = vpop.eup %2008  ;;  %2012 = vrsqrt.f32 %v1611_v12  ;;  %v1827_v29 = vsel %vm1444_vm5, %v3345_v1, %v1826_v22  ;;  %v1844_v32 = vsel %vm1436_vm1, %v3347_v14, %v3346_v8  ;;  %v1642_v10 = vmul.f32 %v2007_v38, %v2894_v3  ;;  %v3355_v37 = vld [vmem:[#allocation57_spill] sm:$0xff]  ;;  %v3356_v53 = vld [vmem:[#allocation44_spill] sm:$0xff]  ;;  %v3363_v6 = vld [vmem:[#allocation39_spill] sm:$0xff] }
 0x16b   :  { %v2011_v0 = vpop.eup %2010  ;;  %v1822_v34 = vsel %vm1448_vm7, %v3349_v57, %v1821_v20  ;;  %v1845_v46 = vsel %vm1438_vm2, %v3352_v7, %v1844_v32  ;;  %v1851_v27 = vsel %vm1436_vm1, %v3355_v37, %v3354_v21  ;;  %v1643_v16 = vmul.f32 %v2009_v11, %v2894_v3  ;;  %v3361_v50 = vld [vmem:[#allocation45_spill] sm:$0xff]  ;;  %v3362_v54 = vld [vmem:[#allocation52_spill] sm:$0xff]  ;;  %v3368_v28 = vld [vmem:[#allocation47_spill] sm:$0xff] }
 0x16c   :  { %v1914_v18 = vmul.f32 %v1822_v34, %v1642_v10  ;;  %v1846_v25 = vsel %vm1440_vm3, %v3358_v58, %v1845_v46  ;;  %v1644_v44 = vmul.f32 %v2011_v0, %v2894_v3  ;;  %v3366_v22 = vld [vmem:[#allocation53_spill] sm:$0xff]  ;;  %v3371_v14 = vld [vmem:[#allocation55_spill] sm:$0xff]  ;;  %v3372_v10 = vld [vmem:[#allocation62_spill] sm:$0xff] }
 0x16d   :  { %v1847_v26 = vsel %vm1442_vm4, %v3362_v54, %v1846_v25  ;;  %v3374_v57 = vld [vmem:[#allocation65_spill] sm:$0xff]  ;;  %v3376_v7 = vld [vmem:[#allocation66_spill] sm:$0xff]  ;;  %v3377_v37 = vld [vmem:[#allocation67_spill] sm:$0xff] }
 0x16e   :  { %v1848_v11 = vsel %vm1444_vm5, %v3366_v22, %v1847_v26  ;;  %v3381_v58 = vld [vmem:[#allocation71_spill] sm:$0xff] }
 0x16f   :  { %v3385_v54 = vld [vmem:[#allocation75_spill] sm:$0xff] }
 0x170   :  { %v1590_v33 = vpop.xlane.xlu1 %1589  ;;  %v3389_v22 = vld [vmem:[#allocation79_spill] sm:$0xff] }
 0x171   :  { %v1612_v63 = vmax.f32 %v1590_v33, 1e-24  ;;  %v3365_v33 = vld [vmem:[#allocation46_spill] sm:$0xff] }
 0x173   :  { %1925 = vxpose.xlu0.b32.start [1/16] %v1909_v41, 128  ;;  %v3334_v41 = vld [vmem:[#allocation34_spill] sm:$0xff]  ;;  %2014 = vrsqrt.f32 %v1612_v63  ;;  %v3370_v63 = vld [vmem:[#allocation61_spill] sm:$0xff] }
 0x174   :  { %v1831_v17 = vsel %vm1438_vm2, %v3334_v41, %v1830_v42  ;;  %v3351_v42 = vld [vmem:[#allocation30_spill] sm:$0xff] }
 0x175   :  { %v1832_v61 = vsel %vm1440_vm3, %v3342_v60, %v1831_v17  ;;  %v1828_v2 = vsel %vm1446_vm6, %v3351_v42, %v1827_v29  ;;  %v3360_v17 = vld [vmem:[#allocation58_spill] sm:$0xff]  ;;  %v3367_v60 = vld [vmem:[#allocation60_spill] sm:$0xff]  ;;  %v3375_v42 = vld [vmem:[#allocation63_spill] sm:$0xff] }
 0x176   :  { %v1833_v47 = vsel %vm1442_vm4, %v3348_v4, %v1832_v61  ;;  %v1829_v36 = vsel %vm1448_vm7, %v3357_v9, %v1828_v2  ;;  %v1852_v48 = vsel %vm1438_vm2, %v3360_v17, %v1851_v27 }
 0x177   :  { %1926 = vxpose.xlu0.b32.cont [2/16] %v1910_v51, 128  ;;  %v1815_v51 = vsel %vm1448_vm7, %v3341_v59, %v1814_v19  ;;  %v1834_v13 = vsel %vm1444_vm5, %v3353_v35, %v1833_v47  ;;  %v3359_v19 = vld [vmem:[#allocation38_spill] sm:$0xff]  ;;  %v1915_v45 = vmul.f32 %v1829_v36, %v1643_v16  ;;  %v3373_v47 = vld [vmem:[#allocation64_spill] sm:$0xff] }
 0x178   :  { %v1913_v30 = vmul.f32 %v1815_v51, %v1641_v24  ;;  %v1835_v41 = vsel %vm1446_vm6, %v3359_v19, %v1834_v13  ;;  %v1858_v34 = vsel %vm1436_vm1, %v3374_v57, %v3373_v47  ;;  %v3382_v19 = vld [vmem:[#allocation72_spill] sm:$0xff]  ;;  %v3397_v47 = vld [vmem:[#allocation87_spill] sm:$0xff] }
 0x179   :  { %v1836_v38 = vsel %vm1448_vm7, %v3363_v6, %v1835_v41  ;;  %v1859_v46 = vsel %vm1438_vm2, %v3376_v7, %v1858_v34  ;;  %v3383_v41 = vld [vmem:[#allocation73_spill] sm:$0xff] }
 0x17a   :  { %v1916_v59 = vmul.f32 %v1836_v38, %v1644_v44  ;;  %v1860_v27 = vsel %vm1440_vm3, %v3377_v37, %v1859_v46  ;;  %v1865_v17 = vsel %vm1436_vm1, %v3383_v41, %v3382_v19  ;;  %v3387_v38 = vld [vmem:[#allocation77_spill] sm:$0xff] }
 0x17b   :  { %1927 = vxpose.xlu0.b32.cont [3/16] %v1911_v15, 128  ;;  %v1838_v15 = vsel %vm1438_vm2, %v3344_v52, %v1837_v40  ;;  %v2013_v40 = vpop.eup %2012  ;;  %v3369_v52 = vld [vmem:[#allocation54_spill] sm:$0xff] }
 0x17c   :  { %v1839_v12 = vsel %vm1440_vm3, %v3350_v55, %v1838_v15  ;;  %v1645_v51 = vmul.f32 %v2013_v40, %v2894_v3  ;;  %v1849_v15 = vsel %vm1446_vm6, %v3369_v52, %v1848_v11  ;;  %v3386_v40 = vld [vmem:[#allocation76_spill] sm:$0xff] }
 0x17d   :  { %v1840_v31 = vsel %vm1442_vm4, %v3356_v53, %v1839_v12  ;;  %v2015_v0 = vpop.eup %2014  ;;  %v1850_v32 = vsel %vm1448_vm7, %v3371_v14, %v1849_v15  ;;  %v3379_v53 = vld [vmem:[#allocation69_spill] sm:$0xff] }
 0x17e   :  { %v1841_v62 = vsel %vm1444_vm5, %v3361_v50, %v1840_v31  ;;  %v1646_v8 = vmul.f32 %v2015_v0, %v2894_v3  ;;  %v3384_v50 = vld [vmem:[#allocation74_spill] sm:$0xff]  ;;  %v3395_v14 = vld [vmem:[#allocation85_spill] sm:$0xff] }
 0x17f   :  { %1928 = vxpose.xlu0.b32.cont [4/16] %v1912_v49, 128  ;;  %v3364_v49 = vld [vmem:[#allocation59_spill] sm:$0xff]  ;;  %v1842_v23 = vsel %vm1446_vm6, %v3365_v33, %v1841_v62  ;;  %v1866_v62 = vsel %vm1438_vm2, %v3384_v50, %v1865_v17 }
 0x180   :  { %v1853_v24 = vsel %vm1440_vm3, %v3364_v49, %v1852_v48  ;;  %v1843_v20 = vsel %vm1448_vm7, %v3368_v28, %v1842_v23  ;;  %v1918_v55 = vmul.f32 %v1850_v32, %v1646_v8  ;;  %v1867_v26 = vsel %vm1440_vm3, %v3385_v54, %v1866_v62  ;;  %v3392_v28 = vld [vmem:[#allocation82_spill] sm:$0xff] }
 0x181   :  { %v1854_v61 = vsel %vm1442_vm4, %v3367_v60, %v1853_v24  ;;  %v1917_v29 = vmul.f32 %v1843_v20, %v1645_v51  ;;  %v1868_v6 = vsel %vm1442_vm4, %v3386_v40, %v1867_v26  ;;  %v3388_v24 = vld [vmem:[#allocation78_spill] sm:$0xff]  ;;  %v3390_v60 = vld [vmem:[#allocation80_spill] sm:$0xff] }
 0x182   :  { %v1855_v1 = vsel %vm1444_vm5, %v3370_v63, %v1854_v61  ;;  %v1869_v49 = vsel %vm1444_vm5, %v3387_v38, %v1868_v6  ;;  %v3391_v61 = vld [vmem:[#allocation81_spill] sm:$0xff]  ;;  %v3393_v63 = vld [vmem:[#allocation83_spill] sm:$0xff] }
 0x183   :  { %1929 = vxpose.xlu0.b32.cont [5/16] %v1913_v30, 128  ;;  %v1856_v4 = vsel %vm1446_vm6, %v3372_v10, %v1855_v1  ;;  %v1870_v33 = vsel %vm1446_vm6, %v3388_v24, %v1869_v49  ;;  %v1872_v0 = vsel %vm1436_vm1, %v3391_v61, %v3390_v60 }
 0x184   :  { %v1592_v43 = vpop.xlane.xlu0 %1591  ;;  %v1857_v2 = vsel %vm1448_vm7, %v3375_v42, %v1856_v4  ;;  %v1871_v11 = vsel %vm1448_vm7, %v3389_v22, %v1870_v33  ;;  %v1873_v20 = vsel %vm1438_vm2, %v3392_v28, %v1872_v0 }
 0x185   :  { %v1613_v39 = vmax.f32 %v1592_v43, 1e-24  ;;  %v3380_v43 = vld [vmem:[#allocation70_spill] sm:$0xff]  ;;  %v1874_v1 = vsel %vm1440_vm3, %v3393_v63, %v1873_v20 }
 0x187   :  { %1930 = vxpose.xlu0.b32.cont [6/16] %v1914_v18, 128  ;;  %2016 = vrsqrt.f32 %v1613_v39  ;;  %v3378_v18 = vld [vmem:[#allocation68_spill] sm:$0xff] }
 0x188   :  { %v1861_v16 = vsel %vm1442_vm4, %v3378_v18, %v1860_v27 }
 0x189   :  { %v1862_v31 = vsel %vm1444_vm5, %v3379_v53, %v1861_v16 }
 0x18a   :  { %v1863_v9 = vsel %vm1446_vm6, %v3380_v43, %v1862_v31 }
 0x18b   :  { %1931 = vxpose.xlu0.b32.cont [7/16] %v1915_v45, 128  ;;  %v1864_v25 = vsel %vm1448_vm7, %v3381_v58, %v1863_v9 }
 0x18f   :  { %1932 = vxpose.xlu0.b32.cont [8/16] %v1916_v59, 128 }
 0x191   :  { %v2017_v30 = vpop.eup %2016 }
 0x192   :  { %v1647_v12 = vmul.f32 %v2017_v30, %v2894_v3  ;;  %v3396_v30 = vld [vmem:[#allocation86_spill] sm:$0xff] }
 0x193   :  { %1933 = vxpose.xlu0.b32.cont [9/16] %v1917_v29, 128  ;;  %v3394_v29 = vld [vmem:[#allocation84_spill] sm:$0xff] }
 0x194   :  { %v1919_v13 = vmul.f32 %v1857_v2, %v1647_v12  ;;  %v1875_v8 = vsel %vm1442_vm4, %v3394_v29, %v1874_v1 }
 0x195   :  { %v1876_v32 = vsel %vm1444_vm5, %v3395_v14, %v1875_v8 }
 0x196   :  { %v1877_v10 = vsel %vm1446_vm6, %v3396_v30, %v1876_v32 }
 0x197   :  { %v1594_v35 = vpop.xlane.xlu1 %1593  ;;  %1934 = vxpose.xlu0.b32.cont [10/16] %v1918_v55, 128  ;;  %v1878_v57 = vsel %vm1448_vm7, %v3397_v47, %v1877_v10 }
 0x198   :  { %v1614_v21 = vmax.f32 %v1594_v35, 1e-24 }
 0x19a   :  { %2018 = vrsqrt.f32 %v1614_v21 }
 0x19b   :  { %1935 = vxpose.xlu0.b32.cont [11/16] %v1919_v13, 128 }
 0x1a4   :  { %v2019_v36 = vpop.eup %2018 }
 0x1a5   :  { %v1648_v39 = vmul.f32 %v2019_v36, %v2894_v3 }
 0x1a7   :  { %v1920_v48 = vmul.f32 %v1864_v25, %v1648_v39 }
 0x1a9   :  { %1936 = vxpose.xlu0.b32.cont [12/16] %v1920_v48, 128 }
 0x1aa   :  { %v1596_v45 = vpop.xlane.xlu0 %1595 }
 0x1ab   :  { %v1615_v44 = vmax.f32 %v1596_v45, 1e-24 }
 0x1ad   :  { %2020 = vrsqrt.f32 %v1615_v44 }
 0x1b7   :  { %v2021_v23 = vpop.eup %2020 }
 0x1b8   :  { %v1649_v59 = vmul.f32 %v2021_v23, %v2894_v3 }
 0x1ba   :  { %v1921_v51 = vmul.f32 %v1871_v11, %v1649_v59 }
 0x1bc   :  { %1937 = vxpose.xlu0.b32.cont [13/16] %v1921_v51, 128 }
 0x1bf   :  { %v1598_v52 = vpop.xlane.xlu1 %1597 }
 0x1c0   :  { %v1616_v15 = vmax.f32 %v1598_v52, 1e-24 }
 0x1c2   :  { %2022 = vrsqrt.f32 %v1616_v15 }
 0x1cc   :  { %v2023_v4 = vpop.eup %2022 }
 0x1cd   :  { %v1650_v34 = vmul.f32 %v2023_v4, %v2894_v3 }
 0x1cf   :  { %v1922_v55 = vmul.f32 %v1878_v57, %v1650_v34 }
 0x1d1   :  { %1938 = vxpose.xlu0.b32.cont [14/16] %v1922_v55, 128 }
 0x1d3   :  { %v1600_v12 = vpop.xlane.xlu0 %1599 }
 0x1d4   :  { %v1617_v42 = vmax.f32 %v1600_v12, 1e-24 }
 0x1d6   :  { %2024 = vrsqrt.f32 %v1617_v42 }
 0x1e0   :  { %v2025_v2 = vpop.eup %2024 }
 0x1e1   :  { %v1651_v7 = vmul.f32 %v2025_v2, %v2894_v3 }
 0x1e3   :  { %v1923_v46 = vmul.f32 %v2997_v5, %v1651_v7 }
 0x1e5   :  { %1939 = vxpose.xlu0.b32.cont [15/16] %v1923_v46, 128 }
 0x1e6   :  { %v1602_v35 = vpop.xlane.xlu1 %1601 }
 0x1e7   :  { %v1618_v13 = vmax.f32 %v1602_v35, 1e-24 }
 0x1e9   :  { %2026 = vrsqrt.f32 %v1618_v13 }
 0x1f3   :  { %v2027_v21 = vpop.eup %2026 }
 0x1f4   :  { %v1652_v37 = vmul.f32 %v2027_v21, %v2894_v3 }
 0x1f6   :  { %v1924_v27 = vmul.f32 %v3001_v56, %v1652_v37 }
 0x1f8   :  { %1940 = vxpose.xlu0.b32.end [16/16] %v1924_v27, 128 }
 0x23c   :  { %v1941_v18 = vpop.trf.xlu0 }
 0x23d   :  { %1957 = vst [vmem:[#allocation6] sm:$0xff] %v1941_v18 }
 0x240   :  { %v1942_v16 = vpop.trf.xlu0 }
 0x241   :  { %1958 = vst [vmem:[#allocation6 + $0x8] sm:$0xff] %v1942_v16 }
 0x244   :  { %v1943_v53 = vpop.trf.xlu0 }
 0x245   :  { %1959 = vst [vmem:[#allocation6 + $0x10] sm:$0xff] %v1943_v53 }
 0x248   :  { %v1944_v31 = vpop.trf.xlu0 }
 0x249   :  { %1960 = vst [vmem:[#allocation6 + $0x18] sm:$0xff] %v1944_v31 }
 0x24c   :  { %v1945_v43 = vpop.trf.xlu0 }
 0x24d   :  { %1961 = vst [vmem:[#allocation6 + $0x20] sm:$0xff] %v1945_v43 }
 0x250   :  { %v1946_v5 = vpop.trf.xlu0 }
 0x251   :  { %1962 = vst [vmem:[#allocation6 + $0x28] sm:$0xff] %v1946_v5 }
 0x254   :  { %v1947_v9 = vpop.trf.xlu0 }
 0x255   :  { %1963 = vst [vmem:[#allocation6 + $0x30] sm:$0xff] %v1947_v9 }
 0x258   :  { %v1948_v36 = vpop.trf.xlu0 }
 0x259   :  { %1964 = vst [vmem:[#allocation6 + $0x38] sm:$0xff] %v1948_v36 }
 0x25c   :  { %v1949_v3 = vpop.trf.xlu0 }
 0x25d   :  { %1965 = vst [vmem:[#allocation6 + $0x40] sm:$0xff] %v1949_v3 }
 0x260   :  { %v1950_v56 = vpop.trf.xlu0 }
 0x261   :  { %1966 = vst [vmem:[#allocation6 + $0x48] sm:$0xff] %v1950_v56 }
 0x264   :  { %v1951_v58 = vpop.trf.xlu0 }
 0x265   :  { %1967 = vst [vmem:[#allocation6 + $0x50] sm:$0xff] %v1951_v58 }
 0x268   :  { %v1952_v25 = vpop.trf.xlu0 }
 0x269   :  { %1968 = vst [vmem:[#allocation6 + $0x58] sm:$0xff] %v1952_v25 }
 0x26c   :  { %v1953_v39 = vpop.trf.xlu0 }
 0x26d   :  { %1969 = vst [vmem:[#allocation6 + $0x60] sm:$0xff] %v1953_v39 }
 0x270   :  { %v1954_v19 = vpop.trf.xlu0 }
 0x271   :  { %1970 = vst [vmem:[#allocation6 + $0x68] sm:$0xff] %v1954_v19 }
 0x274   :  { %v1955_v41 = vpop.trf.xlu0 }
 0x275   :  { %1971 = vst [vmem:[#allocation6 + $0x70] sm:$0xff] %v1955_v41 }
 0x278   :  { %v1956_v17 = vpop.trf.xlu0 }
 0x279   :  { %1972 = vst [vmem:[#allocation6 + $0x78] sm:$0xff] %v1956_v17 }
 0x27a   :  { %2061 = shalt.err (!%p2058_p12)
}
 0x27b   :  { %s2062_s28 = scalar_lea.hbm %s3142_s2, 2048 }
 0x27c   :  { %p2063_p13 = scmp.ne.s32.totalorder %s3142_s2, %s2062_s28  ;;  %p2066_p0 = scmp.lt.u32.totalorder %s2062_s28, %s3142_s2 }
 0x27e   :  { %p2068_p1 = pnand %p2066_p0, %p2063_p13 }
 0x280   :  { %2071 = shalt.err (!%p2068_p1)
}
 0x281   :  { %s2080_s5 = smov 128   ;;  %s2081_s6 = smov 8  }
 0x282   :  { %1984 = dma.vmem_to_hbm [thread:$0]  %s1979_s24, 2048, %s3142_s2, [#allocation5], %s2080_s5, %s2080_s5, %s2081_s6  }
 0x283   :  { %2074 = dma.done.wait [#allocation5], 2048  }
 0x284   :  { %2075 = vsyncadd [#allocation5], 4294965248 }
 0x285   :  { %1988 = vsyncpa [#allocation4], 1 }
 0x286   :  { %1989 = vsyncpa [#allocation5], 1 }

</bundles_post_ra>
